<compile_context>
chip_gen: v7x
topology: tpu7x:2x2x1
jax: 0.10.0
libtpu: 0.0.40
codegen_flags: <defaults>
</compile_context>

<pallas_src>
import jax
import jax.numpy as jnp
from jax import lax
from jax.experimental import pallas as pl
from jax.experimental.pallas import tpu as pltpu
import numpy as np


SUB = 8  # timesteps per interleaved Linear+ReLU head matmul (8-16 per review)


def _round_up(x, m):
    return (x + m - 1) // m * m


def subnet_kernel(gx_ref, whh_ref, wout_ref, bout_ref, y_ref,
                  h_scr, c_scr, hbuf_scr):
    """One grid step = t_chunk LSTM timesteps with the Linear/ReLU head interleaved
    every SUB timesteps.

    gx_ref   : (T, Bp, 4*Hp)   precomputed x @ W_ih + (b_ih + b_hh), time-major (bf16)
    whh_ref  : (Hp, 4*Hp)      recurrent weights (bf16, gate-aligned, zero-padded)
    wout_ref : (Hp, Dp)        output Linear weights (bf16, zero-padded)
    bout_ref : (1, Dp)         output Linear bias (f32, zero-padded)
    y_ref    : (T, Bp, Dp)     lane-dense f32 output chunk (time-major)
    h_scr/c_scr : (Bp, Hp)     f32 recurrent state, persists across grid steps
    hbuf_scr : (SUB, Bp, Hp)   f32 stash of the last SUB hidden states
    """
    T, Bp, _ = gx_ref.shape
    Hp = h_scr.shape[1]
    sub = hbuf_scr.shape[0]
    n_sub = T // sub

    @pl.when(pl.program_id(0) == 0)
    def _():
        h_scr[...] = jnp.zeros_like(h_scr)
        c_scr[...] = jnp.zeros_like(c_scr)

    whh = whh_ref[...]       # grid-invariant; stays in VMEM across the whole chunk
    wout = wout_ref[...]
    bout = bout_ref[...].astype(jnp.float32)

    def sub_chunk(s, carry):
        h, c = carry
        base = pl.multiple_of(s * sub, sub)

        def step(i, hc):
            h, c = hc
            # Only the recurrent projection is on the serial critical path (the input
            # projection is hoisted to the wrapper).  Matmul operands are bf16, the
            # accumulate and the recurrent state stay f32.
            gates = gx_ref[base + i].astype(jnp.float32) + jnp.dot(
                h.astype(whh.dtype), whh, preferred_element_type=jnp.float32)
            # PyTorch gate order i, f, g, o; Hp % 128 == 0 so slices are lane-aligned.
            i_g = jax.nn.sigmoid(gates[:, 0 * Hp:1 * Hp])
            f_g = jax.nn.sigmoid(gates[:, 1 * Hp:2 * Hp])
            g_g = jnp.tanh(gates[:, 2 * Hp:3 * Hp])
            o_g = jax.nn.sigmoid(gates[:, 3 * Hp:4 * Hp])
            c = f_g * c + i_g * g_g
            h = o_g * jnp.tanh(c)
            hbuf_scr[i] = h
            return (h, c)

        # Bounded unroll: only the SUB-step inner loop is unrolled.
        h, c = lax.fori_loop(0, sub, step, (h, c), unroll=True)

        # Interleaved Linear + ReLU head for the SUB steps just produced: one
        # (SUB*Bp, Hp) x (Hp, Dp) MXU matmul + one lane-dense store.  It is
        # independent of later timesteps, so it overlaps the next sub-chunk's
        # recurrence instead of stalling at the end of the chunk.
        h_all = hbuf_scr[...].reshape(sub * Bp, Hp).astype(wout.dtype)
        y = jnp.dot(h_all, wout, preferred_element_type=jnp.float32) + bout
        y = jnp.maximum(y, 0.0)
        y_ref[pl.ds(base, sub)] = y.reshape(sub, Bp, -1).astype(y_ref.dtype)
        return (h, c)

    h, c = lax.fori_loop(0, n_sub, sub_chunk, (h_scr[...], c_scr[...]), unroll=False)
    h_scr[...] = h
    c_scr[...] = c


def subnet_forward(x, params, *, t_chunk=128, matmul_dtype=jnp.bfloat16):
    """x: (B, S, in_size) f32 -> (B, S, out_size) f32 (batch_first, like the module)."""
    B, S, Din = x.shape
    wih, whh, b = params["wih"], params["whh"], params["b"]
    wout, bout = params["wout"], params["bout"]
    H = whh.shape[0]
    Dout = wout.shape[1]

    Bp = _round_up(B, 8)        # sublanes
    Hp = _round_up(H, 128)      # lanes (gate slab size)
    Dp = _round_up(Dout, 128)   # lanes (lane-dense output store)

    # Explicit chunking of the time axis (never the whole sequence): many grid steps
    # -> the next gx chunk DMA double-buffers behind the recurrence, VMEM is bounded.
    t_chunk = _round_up(max(SUB, min(int(t_chunk), _round_up(S, SUB))), SUB)
    Sp = _round_up(S, t_chunk)
    n_chunks = Sp // t_chunk

    # ---- pad weights so each gate occupies a 128-lane-aligned slab and the output is
    #      lane-dense; padded rows/cols are zero so padded lanes stay exactly inert
    #      (requires h0 = c0 = 0, see invariants in the header).
    def pad_gate_cols(w):  # (rows, 4H) -> (rows, 4*Hp), per-gate column padding
        r = w.shape[0]
        w4 = w.reshape(r, 4, H)
        return jnp.pad(w4, ((0, 0), (0, 0), (0, Hp - H))).reshape(r, 4 * Hp)

    wih_p = pad_gate_cols(wih)                                               # (Din, 4Hp) f32
    whh_p = jnp.pad(pad_gate_cols(whh), ((0, Hp - H), (0, 0))).astype(matmul_dtype)
    b_p = pad_gate_cols(b)                                                   # (1, 4Hp) f32
    wout_p = jnp.pad(wout, ((0, Hp - H), (0, Dp - Dout))).astype(matmul_dtype)
    bout_p = jnp.pad(bout, ((0, 0), (0, Dp - Dout)))                         # (1, Dp) f32

    # ---- hoisted input projection: one big XLA matmul, LSTM biases folded in.  The
    #      result (the largest HBM->VMEM stream) is stored in matmul_dtype (bf16).
    x_tm = jnp.transpose(x, (1, 0, 2))                                       # (S, B, Din), tiny
    x_tm = jnp.pad(x_tm, ((0, Sp - S), (0, Bp - B), (0, 0)))                 # (Sp, Bp, Din)
    gx = (jnp.einsum("sbd,dg->sbg", x_tm, wih_p) + b_p).astype(matmul_dtype)  # (Sp, Bp, 4Hp)

    y_tm = pl.pallas_call(
        subnet_kernel,
        out_shape=jax.ShapeDtypeStruct((Sp, Bp, Dp), jnp.float32),
        grid_spec=pltpu.PrefetchScalarGridSpec(
            num_scalar_prefetch=0,
            grid=(n_chunks,),
            in_specs=[
                pl.BlockSpec((t_chunk, Bp, 4 * Hp), lambda t: (t, 0, 0)),  # gates_x chunk
                pl.BlockSpec((Hp, 4 * Hp), lambda t: (0, 0)),              # W_hh (invariant)
                pl.BlockSpec((Hp, Dp), lambda t: (0, 0)),                  # W_out (invariant)
                pl.BlockSpec((1, Dp), lambda t: (0, 0)),                   # b_out (invariant)
            ],
            out_specs=pl.BlockSpec((t_chunk, Bp, Dp), lambda t: (t, 0, 0)),
            scratch_shapes=[
                pltpu.VMEM((Bp, Hp), jnp.float32),        # h state (carried across chunks)
                pltpu.VMEM((Bp, Hp), jnp.float32),        # c state
                pltpu.VMEM((SUB, Bp, Hp), jnp.float32),   # h stash for the interleaved head
            ],
        ),
        compiler_params=pltpu.CompilerParams(
            dimension_semantics=("arbitrary",),           # time is a serial recurrence
            vmem_limit_bytes=32 * 1024 * 1024,
        ),
    )(gx, whh_p, wout_p, bout_p)

    # Slice off batch/lane/time padding BEFORE the layout transpose so the post-kernel
    # HBM pass only touches real (B, S, out_size) data, not the ~32x larger padded slab.
    return jnp.transpose(y_tm[:S, :B, :Dout], (1, 0, 2))


def init_params(key, in_size, hidden_size, out_size):
    """Deterministic synthetic params (PyTorch-style uniform(-1/sqrt(H), 1/sqrt(H))),
    stored already transposed for right-multiplication (x @ W)."""
    ks = jax.random.split(key, 6)
    bound = 1.0 / np.sqrt(hidden_size)
    u = lambda k, shape: jax.random.uniform(k, shape, jnp.float32, -bound, bound)
    wih = u(ks[0], (in_size, 4 * hidden_size))
    whh = u(ks[1], (hidden_size, 4 * hidden_size))
    b = (u(ks[2], (1, 4 * hidden_size)) + u(ks[3], (1, 4 * hidden_size)))  # b_ih + b_hh
    wout = u(ks[4], (hidden_size, out_size))
    bout = u(ks[5], (1, out_size))
    return {"wih": wih, "whh": whh, "b": b, "wout": wout, "bout": bout}


def subnet_reference(x, params):
    """Pure-JAX reference (lax.scan LSTM) for correctness checking."""
    B, S, Din = x.shape
    H = params["whh"].shape[0]

    def step(carry, x_t):
        h, c = carry
        gates = x_t @ params["wih"] + h @ params["whh"] + params["b"][0]
        i = jax.nn.sigmoid(gates[:, 0:H])
        f = jax.nn.sigmoid(gates[:, H:2 * H])
        g = jnp.tanh(gates[:, 2 * H:3 * H])
        o = jax.nn.sigmoid(gates[:, 3 * H:4 * H])
        c = f * c + i * g
        h = o * jnp.tanh(c)
        y = jnp.maximum(h @ params["wout"] + params["bout"][0], 0.0)
        return (h, c), y

    h0 = jnp.zeros((B, H), jnp.float32)
    c0 = jnp.zeros((B, H), jnp.float32)
    _, ys = lax.scan(step, (h0, c0), jnp.transpose(x, (1, 0, 2)))
    return jnp.transpose(ys, (1, 0, 2))


if __name__ == "__main__":
    in_size, hidden_size, out_size = 4, 32, 16
    B, S = 2, 8

    key = jax.random.PRNGKey(0)
    k_x, k_p = jax.random.split(key)
    x = jax.random.normal(k_x, (B, S, in_size), jnp.float32)
    params = init_params(k_p, in_size, hidden_size, out_size)

    y_ref = jax.block_until_ready(subnet_reference(x, params))

    # Strict check of the kernel math with f32 matmuls (same semantics as the module).
    fwd_f32 = jax.jit(lambda xx, pp: subnet_forward(xx, pp, matmul_dtype=jnp.float32))
    y32 = jax.block_until_ready(fwd_f32(x, params))
    assert y32.shape == (B, S, out_size)
    np.testing.assert_allclose(np.asarray(y32), np.asarray(y_ref), atol=1e-4, rtol=1e-4)

    # Default fast path: bf16 matmul operands / bf16 gx stream, f32 state & accumulate.
    fwd = jax.jit(subnet_forward)
    y = jax.block_until_ready(fwd(x, params))
    assert y.shape == (B, S, out_size)
    np.testing.assert_allclose(np.asarray(y), np.asarray(y_ref), atol=5e-2, rtol=5e-2)

    print("KERNEL_OK")
</pallas_src>

<mosaic_0001>
module attributes {stable_mosaic.version = 11 : i64} {
  func.func @subnet_kernel(%arg0: i32, %arg1: memref<8x8x512xf32, #tpu.memory_space<vmem>>, %arg2: memref<128x512xf32, #tpu.memory_space<vmem>>, %arg3: memref<128x128xf32, #tpu.memory_space<vmem>>, %arg4: memref<1x128xf32, #tpu.memory_space<vmem>>, %arg5: memref<8x8x128xf32, #tpu.memory_space<vmem>>, %arg6: memref<8x128xf32, #tpu.memory_space<vmem>>, %arg7: memref<8x128xf32, #tpu.memory_space<vmem>>, %arg8: memref<8x8x128xf32, #tpu.memory_space<vmem>>) attributes {dimension_semantics = [#tpu.dimension_semantics<arbitrary>], iteration_bounds = array<i64: 1>, scalar_prefetch = 0 : i64, scratch_operands = 3 : i64, tpu.core_type = #tpu.core_type<tc>, window_params = [{transform_indices = @transform_0, window_bounds = array<i64: 8, 8, 512>}, {pipeline_mode = #tpu.pipeline_mode<synchronous>, transform_indices = @transform_1, window_bounds = array<i64: 128, 512>}, {pipeline_mode = #tpu.pipeline_mode<synchronous>, transform_indices = @transform_2, window_bounds = array<i64: 128, 128>}, {pipeline_mode = #tpu.pipeline_mode<synchronous>, transform_indices = @transform_3, window_bounds = array<i64: 1, 128>}, {transform_indices = @transform_4, window_bounds = array<i64: 8, 8, 128>}]} {
    %c0_i32 = arith.constant 0 : i32
    %0 = arith.cmpi eq, %arg0, %c0_i32 : i32
    %1 = arith.extui %0 : i1 to i32
    %c0_i32_0 = arith.constant 0 : i32
    %2 = arith.cmpi ne, %1, %c0_i32_0 : i32
    scf.if %2 {
      %cst_88 = arith.constant 0.000000e+00 : f32
      %302 = vector.broadcast %cst_88 : f32 to vector<8x128xf32>
      %c0_89 = arith.constant 0 : index
      %c0_90 = arith.constant 0 : index
      %303 = vector.load %arg6[%c0_89, %c0_90] : memref<8x128xf32, #tpu.memory_space<vmem>>, vector<8x128xf32>
      tpu.vector_store %arg6[%c0_89, %c0_90], %302 {strides = array<i32>} : memref<8x128xf32, #tpu.memory_space<vmem>>, vector<8x128xf32>,
      %cst_91 = arith.constant 0.000000e+00 : f32
      %304 = vector.broadcast %cst_91 : f32 to vector<8x128xf32>
      %c0_92 = arith.constant 0 : index
      %c0_93 = arith.constant 0 : index
      %305 = vector.load %arg7[%c0_92, %c0_93] : memref<8x128xf32, #tpu.memory_space<vmem>>, vector<8x128xf32>
      tpu.vector_store %arg7[%c0_92, %c0_93], %304 {strides = array<i32>} : memref<8x128xf32, #tpu.memory_space<vmem>>, vector<8x128xf32>,
    } else {
    }
    %c0 = arith.constant 0 : index
    %c0_1 = arith.constant 0 : index
    %3 = vector.load %arg2[%c0, %c0_1] : memref<128x512xf32, #tpu.memory_space<vmem>>, vector<128x512xf32>
    %c0_2 = arith.constant 0 : index
    %c0_3 = arith.constant 0 : index
    %4 = vector.load %arg3[%c0_2, %c0_3] : memref<128x128xf32, #tpu.memory_space<vmem>>, vector<128x128xf32>
    %c0_4 = arith.constant 0 : index
    %c0_5 = arith.constant 0 : index
    %5 = vector.load %arg4[%c0_4, %c0_5] : memref<1x128xf32, #tpu.memory_space<vmem>>, vector<1x128xf32>
    %c0_6 = arith.constant 0 : index
    %c0_7 = arith.constant 0 : index
    %6 = vector.load %arg6[%c0_6, %c0_7] : memref<8x128xf32, #tpu.memory_space<vmem>>, vector<8x128xf32>
    %c0_8 = arith.constant 0 : index
    %c0_9 = arith.constant 0 : index
    %7 = vector.load %arg7[%c0_8, %c0_9] : memref<8x128xf32, #tpu.memory_space<vmem>>, vector<8x128xf32>
    %c0_i32_10 = arith.constant 0 : i32
    %c8_i32 = arith.constant 8 : i32
    %8 = arith.muli %c0_i32_10, %c8_i32 : i32
    %9 = tpu.assume_multiple %8, 8 : i32
    %c0_i32_11 = arith.constant 0 : i32
    %10 = arith.addi %9, %c0_i32_11 : i32
    %11 = arith.index_cast %10 : i32 to index
    %c0_12 = arith.constant 0 : index
    %c0_13 = arith.constant 0 : index
    %12 = vector.load %arg1[%11, %c0_12, %c0_13] : memref<8x8x512xf32, #tpu.memory_space<vmem>>, vector<1x8x512xf32>
    %13 = vector.shape_cast %12 : vector<1x8x512xf32> to vector<8x512xf32>
    %cst = arith.constant dense<0.000000e+00> : vector<8x512xf32>
    %14 = tpu.matmul %6, %3, %cst {dimension_numbers = #tpu.dot_dimension_numbers<[1], [0], [0], [1], [0, 0, 1, 1], [], []>} : vector<8x128xf32>, vector<128x512xf32>, vector<8x512xf32> -> vector<8x512xf32>
    %15 = arith.addf %13, %14 : vector<8x512xf32>
    %16 = vector.extract_strided_slice %15 {offsets = [0, 0], sizes = [8, 128], strides = [1, 1]} : vector<8x512xf32> to vector<8x128xf32>
    %17 = arith.negf %16 : vector<8x128xf32>
    %18 = math.exp %17 : vector<8x128xf32>
    %cst_14 = arith.constant 1.000000e+00 : f32
    %19 = vector.broadcast %cst_14 : f32 to vector<8x128xf32>
    %20 = arith.addf %19, %18 : vector<8x128xf32>
    %21 = arith.divf %19, %20 : vector<8x128xf32>
    %22 = vector.extract_strided_slice %15 {offsets = [0, 128], sizes = [8, 128], strides = [1, 1]} : vector<8x512xf32> to vector<8x128xf32>
    %23 = arith.negf %22 : vector<8x128xf32>
    %24 = math.exp %23 : vector<8x128xf32>
    %cst_15 = arith.constant 1.000000e+00 : f32
    %25 = vector.broadcast %cst_15 : f32 to vector<8x128xf32>
    %26 = arith.addf %25, %24 : vector<8x128xf32>
    %27 = arith.divf %25, %26 : vector<8x128xf32>
    %28 = vector.extract_strided_slice %15 {offsets = [0, 256], sizes = [8, 128], strides = [1, 1]} : vector<8x512xf32> to vector<8x128xf32>
    %29 = math.tanh %28 : vector<8x128xf32>
    %30 = vector.extract_strided_slice %15 {offsets = [0, 384], sizes = [8, 128], strides = [1, 1]} : vector<8x512xf32> to vector<8x128xf32>
    %31 = arith.negf %30 : vector<8x128xf32>
    %32 = math.exp %31 : vector<8x128xf32>
    %cst_16 = arith.constant 1.000000e+00 : f32
    %33 = vector.broadcast %cst_16 : f32 to vector<8x128xf32>
    %34 = arith.addf %33, %32 : vector<8x128xf32>
    %35 = arith.divf %33, %34 : vector<8x128xf32>
    %36 = arith.mulf %27, %7 : vector<8x128xf32>
    %37 = arith.mulf %21, %29 : vector<8x128xf32>
    %38 = arith.addf %36, %37 : vector<8x128xf32>
    %39 = math.tanh %38 : vector<8x128xf32>
    %40 = arith.mulf %35, %39 : vector<8x128xf32>
    %41 = arith.index_cast %c0_i32_11 : i32 to index
    %c0_17 = arith.constant 0 : index
    %c0_18 = arith.constant 0 : index
    %42 = vector.load %arg8[%41, %c0_17, %c0_18] : memref<8x8x128xf32, #tpu.memory_space<vmem>>, vector<1x8x128xf32>
    %43 = vector.shape_cast %42 : vector<1x8x128xf32> to vector<8x128xf32>
    %44 = vector.shape_cast %40 : vector<8x128xf32> to vector<1x8x128xf32>
    tpu.vector_store %arg8[%41, %c0_17, %c0_18], %44 {strides = array<i32>} : memref<8x8x128xf32, #tpu.memory_space<vmem>>, vector<1x8x128xf32>,
    %c1_i32 = arith.constant 1 : i32
    %45 = arith.addi %9, %c1_i32 : i32
    %46 = arith.index_cast %45 : i32 to index
    %c0_19 = arith.constant 0 : index
    %c0_20 = arith.constant 0 : index
    %47 = vector.load %arg1[%46, %c0_19, %c0_20] : memref<8x8x512xf32, #tpu.memory_space<vmem>>, vector<1x8x512xf32>
    %48 = vector.shape_cast %47 : vector<1x8x512xf32> to vector<8x512xf32>
    %cst_21 = arith.constant dense<0.000000e+00> : vector<8x512xf32>
    %49 = tpu.matmul %40, %3, %cst_21 {dimension_numbers = #tpu.dot_dimension_numbers<[1], [0], [0], [1], [0, 0, 1, 1], [], []>} : vector<8x128xf32>, vector<128x512xf32>, vector<8x512xf32> -> vector<8x512xf32>
    %50 = arith.addf %48, %49 : vector<8x512xf32>
    %51 = vector.extract_strided_slice %50 {offsets = [0, 0], sizes = [8, 128], strides = [1, 1]} : vector<8x512xf32> to vector<8x128xf32>
    %52 = arith.negf %51 : vector<8x128xf32>
    %53 = math.exp %52 : vector<8x128xf32>
    %cst_22 = arith.constant 1.000000e+00 : f32
    %54 = vector.broadcast %cst_22 : f32 to vector<8x128xf32>
    %55 = arith.addf %54, %53 : vector<8x128xf32>
    %56 = arith.divf %54, %55 : vector<8x128xf32>
    %57 = vector.extract_strided_slice %50 {offsets = [0, 128], sizes = [8, 128], strides = [1, 1]} : vector<8x512xf32> to vector<8x128xf32>
    %58 = arith.negf %57 : vector<8x128xf32>
    %59 = math.exp %58 : vector<8x128xf32>
    %cst_23 = arith.constant 1.000000e+00 : f32
    %60 = vector.broadcast %cst_23 : f32 to vector<8x128xf32>
    %61 = arith.addf %60, %59 : vector<8x128xf32>
    %62 = arith.divf %60, %61 : vector<8x128xf32>
    %63 = vector.extract_strided_slice %50 {offsets = [0, 256], sizes = [8, 128], strides = [1, 1]} : vector<8x512xf32> to vector<8x128xf32>
    %64 = math.tanh %63 : vector<8x128xf32>
    %65 = vector.extract_strided_slice %50 {offsets = [0, 384], sizes = [8, 128], strides = [1, 1]} : vector<8x512xf32> to vector<8x128xf32>
    %66 = arith.negf %65 : vector<8x128xf32>
    %67 = math.exp %66 : vector<8x128xf32>
    %cst_24 = arith.constant 1.000000e+00 : f32
    %68 = vector.broadcast %cst_24 : f32 to vector<8x128xf32>
    %69 = arith.addf %68, %67 : vector<8x128xf32>
    %70 = arith.divf %68, %69 : vector<8x128xf32>
    %71 = arith.mulf %62, %38 : vector<8x128xf32>
    %72 = arith.mulf %56, %64 : vector<8x128xf32>
    %73 = arith.addf %71, %72 : vector<8x128xf32>
    %74 = math.tanh %73 : vector<8x128xf32>
    %75 = arith.mulf %70, %74 : vector<8x128xf32>
    %76 = arith.index_cast %c1_i32 : i32 to index
    %c0_25 = arith.constant 0 : index
    %c0_26 = arith.constant 0 : index
    %77 = vector.load %arg8[%76, %c0_25, %c0_26] : memref<8x8x128xf32, #tpu.memory_space<vmem>>, vector<1x8x128xf32>
    %78 = vector.shape_cast %77 : vector<1x8x128xf32> to vector<8x128xf32>
    %79 = vector.shape_cast %75 : vector<8x128xf32> to vector<1x8x128xf32>
    tpu.vector_store %arg8[%76, %c0_25, %c0_26], %79 {strides = array<i32>} : memref<8x8x128xf32, #tpu.memory_space<vmem>>, vector<1x8x128xf32>,
    %c2_i32 = arith.constant 2 : i32
    %80 = arith.addi %9, %c2_i32 : i32
    %81 = arith.index_cast %80 : i32 to index
    %c0_27 = arith.constant 0 : index
    %c0_28 = arith.constant 0 : index
    %82 = vector.load %arg1[%81, %c0_27, %c0_28] : memref<8x8x512xf32, #tpu.memory_space<vmem>>, vector<1x8x512xf32>
    %83 = vector.shape_cast %82 : vector<1x8x512xf32> to vector<8x512xf32>
    %cst_29 = arith.constant dense<0.000000e+00> : vector<8x512xf32>
    %84 = tpu.matmul %75, %3, %cst_29 {dimension_numbers = #tpu.dot_dimension_numbers<[1], [0], [0], [1], [0, 0, 1, 1], [], []>} : vector<8x128xf32>, vector<128x512xf32>, vector<8x512xf32> -> vector<8x512xf32>
    %85 = arith.addf %83, %84 : vector<8x512xf32>
    %86 = vector.extract_strided_slice %85 {offsets = [0, 0], sizes = [8, 128], strides = [1, 1]} : vector<8x512xf32> to vector<8x128xf32>
    %87 = arith.negf %86 : vector<8x128xf32>
    %88 = math.exp %87 : vector<8x128xf32>
    %cst_30 = arith.constant 1.000000e+00 : f32
    %89 = vector.broadcast %cst_30 : f32 to vector<8x128xf32>
    %90 = arith.addf %89, %88 : vector<8x128xf32>
    %91 = arith.divf %89, %90 : vector<8x128xf32>
    %92 = vector.extract_strided_slice %85 {offsets = [0, 128], sizes = [8, 128], strides = [1, 1]} : vector<8x512xf32> to vector<8x128xf32>
    %93 = arith.negf %92 : vector<8x128xf32>
    %94 = math.exp %93 : vector<8x128xf32>
    %cst_31 = arith.constant 1.000000e+00 : f32
    %95 = vector.broadcast %cst_31 : f32 to vector<8x128xf32>
    %96 = arith.addf %95, %94 : vector<8x128xf32>
    %97 = arith.divf %95, %96 : vector<8x128xf32>
    %98 = vector.extract_strided_slice %85 {offsets = [0, 256], sizes = [8, 128], strides = [1, 1]} : vector<8x512xf32> to vector<8x128xf32>
    %99 = math.tanh %98 : vector<8x128xf32>
    %100 = vector.extract_strided_slice %85 {offsets = [0, 384], sizes = [8, 128], strides = [1, 1]} : vector<8x512xf32> to vector<8x128xf32>
    %101 = arith.negf %100 : vector<8x128xf32>
    %102 = math.exp %101 : vector<8x128xf32>
    %cst_32 = arith.constant 1.000000e+00 : f32
    %103 = vector.broadcast %cst_32 : f32 to vector<8x128xf32>
    %104 = arith.addf %103, %102 : vector<8x128xf32>
    %105 = arith.divf %103, %104 : vector<8x128xf32>
    %106 = arith.mulf %97, %73 : vector<8x128xf32>
    %107 = arith.mulf %91, %99 : vector<8x128xf32>
    %108 = arith.addf %106, %107 : vector<8x128xf32>
    %109 = math.tanh %108 : vector<8x128xf32>
    %110 = arith.mulf %105, %109 : vector<8x128xf32>
    %111 = arith.index_cast %c2_i32 : i32 to index
    %c0_33 = arith.constant 0 : index
    %c0_34 = arith.constant 0 : index
    %112 = vector.load %arg8[%111, %c0_33, %c0_34] : memref<8x8x128xf32, #tpu.memory_space<vmem>>, vector<1x8x128xf32>
    %113 = vector.shape_cast %112 : vector<1x8x128xf32> to vector<8x128xf32>
    %114 = vector.shape_cast %110 : vector<8x128xf32> to vector<1x8x128xf32>
    tpu.vector_store %arg8[%111, %c0_33, %c0_34], %114 {strides = array<i32>} : memref<8x8x128xf32, #tpu.memory_space<vmem>>, vector<1x8x128xf32>,
    %c3_i32 = arith.constant 3 : i32
    %115 = arith.addi %9, %c3_i32 : i32
    %116 = arith.index_cast %115 : i32 to index
    %c0_35 = arith.constant 0 : index
    %c0_36 = arith.constant 0 : index
    %117 = vector.load %arg1[%116, %c0_35, %c0_36] : memref<8x8x512xf32, #tpu.memory_space<vmem>>, vector<1x8x512xf32>
    %118 = vector.shape_cast %117 : vector<1x8x512xf32> to vector<8x512xf32>
    %cst_37 = arith.constant dense<0.000000e+00> : vector<8x512xf32>
    %119 = tpu.matmul %110, %3, %cst_37 {dimension_numbers = #tpu.dot_dimension_numbers<[1], [0], [0], [1], [0, 0, 1, 1], [], []>} : vector<8x128xf32>, vector<128x512xf32>, vector<8x512xf32> -> vector<8x512xf32>
    %120 = arith.addf %118, %119 : vector<8x512xf32>
    %121 = vector.extract_strided_slice %120 {offsets = [0, 0], sizes = [8, 128], strides = [1, 1]} : vector<8x512xf32> to vector<8x128xf32>
    %122 = arith.negf %121 : vector<8x128xf32>
    %123 = math.exp %122 : vector<8x128xf32>
    %cst_38 = arith.constant 1.000000e+00 : f32
    %124 = vector.broadcast %cst_38 : f32 to vector<8x128xf32>
    %125 = arith.addf %124, %123 : vector<8x128xf32>
    %126 = arith.divf %124, %125 : vector<8x128xf32>
    %127 = vector.extract_strided_slice %120 {offsets = [0, 128], sizes = [8, 128], strides = [1, 1]} : vector<8x512xf32> to vector<8x128xf32>
    %128 = arith.negf %127 : vector<8x128xf32>
    %129 = math.exp %128 : vector<8x128xf32>
    %cst_39 = arith.constant 1.000000e+00 : f32
    %130 = vector.broadcast %cst_39 : f32 to vector<8x128xf32>
    %131 = arith.addf %130, %129 : vector<8x128xf32>
    %132 = arith.divf %130, %131 : vector<8x128xf32>
    %133 = vector.extract_strided_slice %120 {offsets = [0, 256], sizes = [8, 128], strides = [1, 1]} : vector<8x512xf32> to vector<8x128xf32>
    %134 = math.tanh %133 : vector<8x128xf32>
    %135 = vector.extract_strided_slice %120 {offsets = [0, 384], sizes = [8, 128], strides = [1, 1]} : vector<8x512xf32> to vector<8x128xf32>
    %136 = arith.negf %135 : vector<8x128xf32>
    %137 = math.exp %136 : vector<8x128xf32>
    %cst_40 = arith.constant 1.000000e+00 : f32
    %138 = vector.broadcast %cst_40 : f32 to vector<8x128xf32>
    %139 = arith.addf %138, %137 : vector<8x128xf32>
    %140 = arith.divf %138, %139 : vector<8x128xf32>
    %141 = arith.mulf %132, %108 : vector<8x128xf32>
    %142 = arith.mulf %126, %134 : vector<8x128xf32>
    %143 = arith.addf %141, %142 : vector<8x128xf32>
    %144 = math.tanh %143 : vector<8x128xf32>
    %145 = arith.mulf %140, %144 : vector<8x128xf32>
    %146 = arith.index_cast %c3_i32 : i32 to index
    %c0_41 = arith.constant 0 : index
    %c0_42 = arith.constant 0 : index
    %147 = vector.load %arg8[%146, %c0_41, %c0_42] : memref<8x8x128xf32, #tpu.memory_space<vmem>>, vector<1x8x128xf32>
    %148 = vector.shape_cast %147 : vector<1x8x128xf32> to vector<8x128xf32>
    %149 = vector.shape_cast %145 : vector<8x128xf32> to vector<1x8x128xf32>
    tpu.vector_store %arg8[%146, %c0_41, %c0_42], %149 {strides = array<i32>} : memref<8x8x128xf32, #tpu.memory_space<vmem>>, vector<1x8x128xf32>,
    %c4_i32 = arith.constant 4 : i32
    %150 = arith.addi %9, %c4_i32 : i32
    %151 = arith.index_cast %150 : i32 to index
    %c0_43 = arith.constant 0 : index
    %c0_44 = arith.constant 0 : index
    %152 = vector.load %arg1[%151, %c0_43, %c0_44] : memref<8x8x512xf32, #tpu.memory_space<vmem>>, vector<1x8x512xf32>
    %153 = vector.shape_cast %152 : vector<1x8x512xf32> to vector<8x512xf32>
    %cst_45 = arith.constant dense<0.000000e+00> : vector<8x512xf32>
    %154 = tpu.matmul %145, %3, %cst_45 {dimension_numbers = #tpu.dot_dimension_numbers<[1], [0], [0], [1], [0, 0, 1, 1], [], []>} : vector<8x128xf32>, vector<128x512xf32>, vector<8x512xf32> -> vector<8x512xf32>
    %155 = arith.addf %153, %154 : vector<8x512xf32>
    %156 = vector.extract_strided_slice %155 {offsets = [0, 0], sizes = [8, 128], strides = [1, 1]} : vector<8x512xf32> to vector<8x128xf32>
    %157 = arith.negf %156 : vector<8x128xf32>
    %158 = math.exp %157 : vector<8x128xf32>
    %cst_46 = arith.constant 1.000000e+00 : f32
    %159 = vector.broadcast %cst_46 : f32 to vector<8x128xf32>
    %160 = arith.addf %159, %158 : vector<8x128xf32>
    %161 = arith.divf %159, %160 : vector<8x128xf32>
    %162 = vector.extract_strided_slice %155 {offsets = [0, 128], sizes = [8, 128], strides = [1, 1]} : vector<8x512xf32> to vector<8x128xf32>
    %163 = arith.negf %162 : vector<8x128xf32>
    %164 = math.exp %163 : vector<8x128xf32>
    %cst_47 = arith.constant 1.000000e+00 : f32
    %165 = vector.broadcast %cst_47 : f32 to vector<8x128xf32>
    %166 = arith.addf %165, %164 : vector<8x128xf32>
    %167 = arith.divf %165, %166 : vector<8x128xf32>
    %168 = vector.extract_strided_slice %155 {offsets = [0, 256], sizes = [8, 128], strides = [1, 1]} : vector<8x512xf32> to vector<8x128xf32>
    %169 = math.tanh %168 : vector<8x128xf32>
    %170 = vector.extract_strided_slice %155 {offsets = [0, 384], sizes = [8, 128], strides = [1, 1]} : vector<8x512xf32> to vector<8x128xf32>
    %171 = arith.negf %170 : vector<8x128xf32>
    %172 = math.exp %171 : vector<8x128xf32>
    %cst_48 = arith.constant 1.000000e+00 : f32
    %173 = vector.broadcast %cst_48 : f32 to vector<8x128xf32>
    %174 = arith.addf %173, %172 : vector<8x128xf32>
    %175 = arith.divf %173, %174 : vector<8x128xf32>
    %176 = arith.mulf %167, %143 : vector<8x128xf32>
    %177 = arith.mulf %161, %169 : vector<8x128xf32>
    %178 = arith.addf %176, %177 : vector<8x128xf32>
    %179 = math.tanh %178 : vector<8x128xf32>
    %180 = arith.mulf %175, %179 : vector<8x128xf32>
    %181 = arith.index_cast %c4_i32 : i32 to index
    %c0_49 = arith.constant 0 : index
    %c0_50 = arith.constant 0 : index
    %182 = vector.load %arg8[%181, %c0_49, %c0_50] : memref<8x8x128xf32, #tpu.memory_space<vmem>>, vector<1x8x128xf32>
    %183 = vector.shape_cast %182 : vector<1x8x128xf32> to vector<8x128xf32>
    %184 = vector.shape_cast %180 : vector<8x128xf32> to vector<1x8x128xf32>
    tpu.vector_store %arg8[%181, %c0_49, %c0_50], %184 {strides = array<i32>} : memref<8x8x128xf32, #tpu.memory_space<vmem>>, vector<1x8x128xf32>,
    %c5_i32 = arith.constant 5 : i32
    %185 = arith.addi %9, %c5_i32 : i32
    %186 = arith.index_cast %185 : i32 to index
    %c0_51 = arith.constant 0 : index
    %c0_52 = arith.constant 0 : index
    %187 = vector.load %arg1[%186, %c0_51, %c0_52] : memref<8x8x512xf32, #tpu.memory_space<vmem>>, vector<1x8x512xf32>
    %188 = vector.shape_cast %187 : vector<1x8x512xf32> to vector<8x512xf32>
    %cst_53 = arith.constant dense<0.000000e+00> : vector<8x512xf32>
    %189 = tpu.matmul %180, %3, %cst_53 {dimension_numbers = #tpu.dot_dimension_numbers<[1], [0], [0], [1], [0, 0, 1, 1], [], []>} : vector<8x128xf32>, vector<128x512xf32>, vector<8x512xf32> -> vector<8x512xf32>
    %190 = arith.addf %188, %189 : vector<8x512xf32>
    %191 = vector.extract_strided_slice %190 {offsets = [0, 0], sizes = [8, 128], strides = [1, 1]} : vector<8x512xf32> to vector<8x128xf32>
    %192 = arith.negf %191 : vector<8x128xf32>
    %193 = math.exp %192 : vector<8x128xf32>
    %cst_54 = arith.constant 1.000000e+00 : f32
    %194 = vector.broadcast %cst_54 : f32 to vector<8x128xf32>
    %195 = arith.addf %194, %193 : vector<8x128xf32>
    %196 = arith.divf %194, %195 : vector<8x128xf32>
    %197 = vector.extract_strided_slice %190 {offsets = [0, 128], sizes = [8, 128], strides = [1, 1]} : vector<8x512xf32> to vector<8x128xf32>
    %198 = arith.negf %197 : vector<8x128xf32>
    %199 = math.exp %198 : vector<8x128xf32>
    %cst_55 = arith.constant 1.000000e+00 : f32
    %200 = vector.broadcast %cst_55 : f32 to vector<8x128xf32>
    %201 = arith.addf %200, %199 : vector<8x128xf32>
    %202 = arith.divf %200, %201 : vector<8x128xf32>
    %203 = vector.extract_strided_slice %190 {offsets = [0, 256], sizes = [8, 128], strides = [1, 1]} : vector<8x512xf32> to vector<8x128xf32>
    %204 = math.tanh %203 : vector<8x128xf32>
    %205 = vector.extract_strided_slice %190 {offsets = [0, 384], sizes = [8, 128], strides = [1, 1]} : vector<8x512xf32> to vector<8x128xf32>
    %206 = arith.negf %205 : vector<8x128xf32>
    %207 = math.exp %206 : vector<8x128xf32>
    %cst_56 = arith.constant 1.000000e+00 : f32
    %208 = vector.broadcast %cst_56 : f32 to vector<8x128xf32>
    %209 = arith.addf %208, %207 : vector<8x128xf32>
    %210 = arith.divf %208, %209 : vector<8x128xf32>
    %211 = arith.mulf %202, %178 : vector<8x128xf32>
    %212 = arith.mulf %196, %204 : vector<8x128xf32>
    %213 = arith.addf %211, %212 : vector<8x128xf32>
    %214 = math.tanh %213 : vector<8x128xf32>
    %215 = arith.mulf %210, %214 : vector<8x128xf32>
    %216 = arith.index_cast %c5_i32 : i32 to index
    %c0_57 = arith.constant 0 : index
    %c0_58 = arith.constant 0 : index
    %217 = vector.load %arg8[%216, %c0_57, %c0_58] : memref<8x8x128xf32, #tpu.memory_space<vmem>>, vector<1x8x128xf32>
    %218 = vector.shape_cast %217 : vector<1x8x128xf32> to vector<8x128xf32>
    %219 = vector.shape_cast %215 : vector<8x128xf32> to vector<1x8x128xf32>
    tpu.vector_store %arg8[%216, %c0_57, %c0_58], %219 {strides = array<i32>} : memref<8x8x128xf32, #tpu.memory_space<vmem>>, vector<1x8x128xf32>,
    %c6_i32 = arith.constant 6 : i32
    %220 = arith.addi %9, %c6_i32 : i32
    %221 = arith.index_cast %220 : i32 to index
    %c0_59 = arith.constant 0 : index
    %c0_60 = arith.constant 0 : index
    %222 = vector.load %arg1[%221, %c0_59, %c0_60] : memref<8x8x512xf32, #tpu.memory_space<vmem>>, vector<1x8x512xf32>
    %223 = vector.shape_cast %222 : vector<1x8x512xf32> to vector<8x512xf32>
    %cst_61 = arith.constant dense<0.000000e+00> : vector<8x512xf32>
    %224 = tpu.matmul %215, %3, %cst_61 {dimension_numbers = #tpu.dot_dimension_numbers<[1], [0], [0], [1], [0, 0, 1, 1], [], []>} : vector<8x128xf32>, vector<128x512xf32>, vector<8x512xf32> -> vector<8x512xf32>
    %225 = arith.addf %223, %224 : vector<8x512xf32>
    %226 = vector.extract_strided_slice %225 {offsets = [0, 0], sizes = [8, 128], strides = [1, 1]} : vector<8x512xf32> to vector<8x128xf32>
    %227 = arith.negf %226 : vector<8x128xf32>
    %228 = math.exp %227 : vector<8x128xf32>
    %cst_62 = arith.constant 1.000000e+00 : f32
    %229 = vector.broadcast %cst_62 : f32 to vector<8x128xf32>
    %230 = arith.addf %229, %228 : vector<8x128xf32>
    %231 = arith.divf %229, %230 : vector<8x128xf32>
    %232 = vector.extract_strided_slice %225 {offsets = [0, 128], sizes = [8, 128], strides = [1, 1]} : vector<8x512xf32> to vector<8x128xf32>
    %233 = arith.negf %232 : vector<8x128xf32>
    %234 = math.exp %233 : vector<8x128xf32>
    %cst_63 = arith.constant 1.000000e+00 : f32
    %235 = vector.broadcast %cst_63 : f32 to vector<8x128xf32>
    %236 = arith.addf %235, %234 : vector<8x128xf32>
    %237 = arith.divf %235, %236 : vector<8x128xf32>
    %238 = vector.extract_strided_slice %225 {offsets = [0, 256], sizes = [8, 128], strides = [1, 1]} : vector<8x512xf32> to vector<8x128xf32>
    %239 = math.tanh %238 : vector<8x128xf32>
    %240 = vector.extract_strided_slice %225 {offsets = [0, 384], sizes = [8, 128], strides = [1, 1]} : vector<8x512xf32> to vector<8x128xf32>
    %241 = arith.negf %240 : vector<8x128xf32>
    %242 = math.exp %241 : vector<8x128xf32>
    %cst_64 = arith.constant 1.000000e+00 : f32
    %243 = vector.broadcast %cst_64 : f32 to vector<8x128xf32>
    %244 = arith.addf %243, %242 : vector<8x128xf32>
    %245 = arith.divf %243, %244 : vector<8x128xf32>
    %246 = arith.mulf %237, %213 : vector<8x128xf32>
    %247 = arith.mulf %231, %239 : vector<8x128xf32>
    %248 = arith.addf %246, %247 : vector<8x128xf32>
    %249 = math.tanh %248 : vector<8x128xf32>
    %250 = arith.mulf %245, %249 : vector<8x128xf32>
    %251 = arith.index_cast %c6_i32 : i32 to index
    %c0_65 = arith.constant 0 : index
    %c0_66 = arith.constant 0 : index
    %252 = vector.load %arg8[%251, %c0_65, %c0_66] : memref<8x8x128xf32, #tpu.memory_space<vmem>>, vector<1x8x128xf32>
    %253 = vector.shape_cast %252 : vector<1x8x128xf32> to vector<8x128xf32>
    %254 = vector.shape_cast %250 : vector<8x128xf32> to vector<1x8x128xf32>
    tpu.vector_store %arg8[%251, %c0_65, %c0_66], %254 {strides = array<i32>} : memref<8x8x128xf32, #tpu.memory_space<vmem>>, vector<1x8x128xf32>,
    %c7_i32 = arith.constant 7 : i32
    %255 = arith.addi %9, %c7_i32 : i32
    %256 = arith.index_cast %255 : i32 to index
    %c0_67 = arith.constant 0 : index
    %c0_68 = arith.constant 0 : index
    %257 = vector.load %arg1[%256, %c0_67, %c0_68] : memref<8x8x512xf32, #tpu.memory_space<vmem>>, vector<1x8x512xf32>
    %258 = vector.shape_cast %257 : vector<1x8x512xf32> to vector<8x512xf32>
    %cst_69 = arith.constant dense<0.000000e+00> : vector<8x512xf32>
    %259 = tpu.matmul %250, %3, %cst_69 {dimension_numbers = #tpu.dot_dimension_numbers<[1], [0], [0], [1], [0, 0, 1, 1], [], []>} : vector<8x128xf32>, vector<128x512xf32>, vector<8x512xf32> -> vector<8x512xf32>
    %260 = arith.addf %258, %259 : vector<8x512xf32>
    %261 = vector.extract_strided_slice %260 {offsets = [0, 0], sizes = [8, 128], strides = [1, 1]} : vector<8x512xf32> to vector<8x128xf32>
    %262 = arith.negf %261 : vector<8x128xf32>
    %263 = math.exp %262 : vector<8x128xf32>
    %cst_70 = arith.constant 1.000000e+00 : f32
    %264 = vector.broadcast %cst_70 : f32 to vector<8x128xf32>
    %265 = arith.addf %264, %263 : vector<8x128xf32>
    %266 = arith.divf %264, %265 : vector<8x128xf32>
    %267 = vector.extract_strided_slice %260 {offsets = [0, 128], sizes = [8, 128], strides = [1, 1]} : vector<8x512xf32> to vector<8x128xf32>
    %268 = arith.negf %267 : vector<8x128xf32>
    %269 = math.exp %268 : vector<8x128xf32>
    %cst_71 = arith.constant 1.000000e+00 : f32
    %270 = vector.broadcast %cst_71 : f32 to vector<8x128xf32>
    %271 = arith.addf %270, %269 : vector<8x128xf32>
    %272 = arith.divf %270, %271 : vector<8x128xf32>
    %273 = vector.extract_strided_slice %260 {offsets = [0, 256], sizes = [8, 128], strides = [1, 1]} : vector<8x512xf32> to vector<8x128xf32>
    %274 = math.tanh %273 : vector<8x128xf32>
    %275 = vector.extract_strided_slice %260 {offsets = [0, 384], sizes = [8, 128], strides = [1, 1]} : vector<8x512xf32> to vector<8x128xf32>
    %276 = arith.negf %275 : vector<8x128xf32>
    %277 = math.exp %276 : vector<8x128xf32>
    %cst_72 = arith.constant 1.000000e+00 : f32
    %278 = vector.broadcast %cst_72 : f32 to vector<8x128xf32>
    %279 = arith.addf %278, %277 : vector<8x128xf32>
    %280 = arith.divf %278, %279 : vector<8x128xf32>
    %281 = arith.mulf %272, %248 : vector<8x128xf32>
    %282 = arith.mulf %266, %274 : vector<8x128xf32>
    %283 = arith.addf %281, %282 : vector<8x128xf32>
    %284 = math.tanh %283 : vector<8x128xf32>
    %285 = arith.mulf %280, %284 : vector<8x128xf32>
    %286 = arith.index_cast %c7_i32 : i32 to index
    %c0_73 = arith.constant 0 : index
    %c0_74 = arith.constant 0 : index
    %287 = vector.load %arg8[%286, %c0_73, %c0_74] : memref<8x8x128xf32, #tpu.memory_space<vmem>>, vector<1x8x128xf32>
    %288 = vector.shape_cast %287 : vector<1x8x128xf32> to vector<8x128xf32>
    %289 = vector.shape_cast %285 : vector<8x128xf32> to vector<1x8x128xf32>
    tpu.vector_store %arg8[%286, %c0_73, %c0_74], %289 {strides = array<i32>} : memref<8x8x128xf32, #tpu.memory_space<vmem>>, vector<1x8x128xf32>,
    %c8_i32_75 = arith.constant 8 : i32
    %c0_76 = arith.constant 0 : index
    %c0_77 = arith.constant 0 : index
    %c0_78 = arith.constant 0 : index
    %290 = vector.load %arg8[%c0_76, %c0_77, %c0_78] : memref<8x8x128xf32, #tpu.memory_space<vmem>>, vector<8x8x128xf32>
    %291 = vector.shape_cast %290 : vector<8x8x128xf32> to vector<64x128xf32>
    %cst_79 = arith.constant dense<0.000000e+00> : vector<64x128xf32>
    %292 = tpu.matmul %291, %4, %cst_79 {dimension_numbers = #tpu.dot_dimension_numbers<[1], [0], [0], [1], [0, 0, 1, 1], [], []>} : vector<64x128xf32>, vector<128x128xf32>, vector<64x128xf32> -> vector<64x128xf32>
    %293 = vector.broadcast %5 : vector<1x128xf32> to vector<64x128xf32>
    %294 = arith.addf %292, %293 : vector<64x128xf32>
    %cst_80 = arith.constant 0.000000e+00 : f32
    %295 = vector.broadcast %cst_80 : f32 to vector<64x128xf32>
    %296 = arith.maximumf %294, %295 : vector<64x128xf32>
    %297 = vector.shape_cast %296 : vector<64x128xf32> to vector<8x8x128xf32>
    %298 = arith.index_cast %9 : i32 to index
    %c0_81 = arith.constant 0 : index
    %c0_82 = arith.constant 0 : index
    %299 = vector.load %arg5[%298, %c0_81, %c0_82] : memref<8x8x128xf32, #tpu.memory_space<vmem>>, vector<8x8x128xf32>
    tpu.vector_store %arg5[%298, %c0_81, %c0_82], %297 {strides = array<i32>} : memref<8x8x128xf32, #tpu.memory_space<vmem>>, vector<8x8x128xf32>,
    %c1_i32_83 = arith.constant 1 : i32
    %c0_84 = arith.constant 0 : index
    %c0_85 = arith.constant 0 : index
    %300 = vector.load %arg6[%c0_84, %c0_85] : memref<8x128xf32, #tpu.memory_space<vmem>>, vector<8x128xf32>
    tpu.vector_store %arg6[%c0_84, %c0_85], %285 {strides = array<i32>} : memref<8x128xf32, #tpu.memory_space<vmem>>, vector<8x128xf32>,
    %c0_86 = arith.constant 0 : index
    %c0_87 = arith.constant 0 : index
    %301 = vector.load %arg7[%c0_86, %c0_87] : memref<8x128xf32, #tpu.memory_space<vmem>>, vector<8x128xf32>
    tpu.vector_store %arg7[%c0_86, %c0_87], %283 {strides = array<i32>} : memref<8x128xf32, #tpu.memory_space<vmem>>, vector<8x128xf32>,
    return
  }
  func.func @transform_0(%arg0: i32) -> (i32, i32, i32) {
    %c0_i32 = arith.constant 0 : i32
    %c0_i32_0 = arith.constant 0 : i32
    %c0_i32_1 = arith.constant 0 : i32
    return %arg0, %c0_i32, %c0_i32_0 : i32, i32, i32
  }
  func.func @transform_1(%arg0: i32) -> (i32, i32) {
    %c0_i32 = arith.constant 0 : i32
    %c0_i32_0 = arith.constant 0 : i32
    %c0_i32_1 = arith.constant 0 : i32
    return %c0_i32, %c0_i32_0 : i32, i32
  }
  func.func @transform_2(%arg0: i32) -> (i32, i32) {
    %c0_i32 = arith.constant 0 : i32
    %c0_i32_0 = arith.constant 0 : i32
    %c0_i32_1 = arith.constant 0 : i32
    return %c0_i32, %c0_i32_0 : i32, i32
  }
  func.func @transform_3(%arg0: i32) -> (i32, i32) {
    %c0_i32 = arith.constant 0 : i32
    %c0_i32_0 = arith.constant 0 : i32
    %c0_i32_1 = arith.constant 0 : i32
    return %c0_i32, %c0_i32_0 : i32, i32
  }
  func.func @transform_4(%arg0: i32) -> (i32, i32, i32) {
    %c0_i32 = arith.constant 0 : i32
    %c0_i32_0 = arith.constant 0 : i32
    %c0_i32_1 = arith.constant 0 : i32
    return %arg0, %c0_i32, %c0_i32_0 : i32, i32, i32
  }
}

</mosaic_0001>

<bundles_post_ra>
// kernel: _lambda_.1
= control target key start
LH: loop header
LB: loop body
LE: loop exit
PB: predicated region body
PF: predicated region fallthrough
CT: control target
= control target key end

     0   :  { %v2488_v3 = vmov 0.0   ;;  %s3273_s1 = inlined_call_operand.vmem [shape: f32[128,512], index: 1, kind: input, shape index: {}]   ;;  %s3274_s0 = inlined_call_operand.vmem [shape: f32[8,8,512], index: 0, kind: input, shape index: {}]   ;;  %s3275_s2 = inlined_call_operand.vmem [shape: f32[128,128], index: 2, kind: input, shape index: {}]   ;;  %s3276_s3 = inlined_call_operand.vmem [shape: f32[1,128], index: 3, kind: input, shape index: {}]   ;;  %s3277_s4 = inlined_call_operand.vmem [shape: f32[8,8,128], index: 4, kind: output, shape index: {}]  }
   0x1   :  { %v24_v0 = vld [vmem:[%s3273_s1 + $0x8] sm:$0xff]  ;;  %v23_v2 = vld [vmem:[%s3273_s1] sm:$0xff]  ;;  %177 = vmatprep.mubr.f32.mxu1 %v2488_v3  ;;  %356 = vmatprep.mubr.f32.mxu0 %v2488_v3  ;;  %v26_v48 = vld [vmem:[%s3273_s1 + $0x18] sm:$0xff] }
   0x2   :  { %v28_v1 = vld [vmem:[%s3273_s1 + $0x28] sm:$0xff]  ;;  %v27_v5 = vld [vmem:[%s3273_s1 + $0x20] sm:$0xff]  ;;  %v30_v49 = vld [vmem:[%s3273_s1 + $0x38] sm:$0xff] }
   0x3   :  { %v2525_v4 = vpack.c.bf16 %v28_v1, %v24_v0  ;;  %v32_v6 = vld [vmem:[%s3273_s1 + $0x48] sm:$0xff]  ;;  %v2536_v8 = vpack.c.bf16 %v27_v5, %v23_v2  ;;  %v31_v10 = vld [vmem:[%s3273_s1 + $0x40] sm:$0xff]  ;;  %v2679_v51 = vpack.c.bf16 %v30_v49, %v26_v48  ;;  %v25_v52 = vld [vmem:[%s3273_s1 + $0x10] sm:$0xff] }
   0x4   :  { %v36_v7 = vld [vmem:[%s3273_s1 + $0x68] sm:$0xff]  ;;  %v35_v11 = vld [vmem:[%s3273_s1 + $0x60] sm:$0xff]  ;;  %v29_v53 = vld [vmem:[%s3273_s1 + $0x30] sm:$0xff] }
   0x5   :  { %v2538_v9 = vpack.c.bf16 %v36_v7, %v32_v6  ;;  %v40_v12 = vld [vmem:[%s3273_s1 + $0x88] sm:$0xff]  ;;  %1816 = vmatprep.subr.bf16.mxu1 %v2525_v4  ;;  %1880 = vmatprep.subr.bf16.mxu0 %v2525_v4  ;;  %v2555_v14 = vpack.c.bf16 %v35_v11, %v31_v10  ;;  %v39_v16 = vld [vmem:[%s3273_s1 + $0x80] sm:$0xff]  ;;  %v34_v54 = vld [vmem:[%s3273_s1 + $0x58] sm:$0xff]  ;;  %v2695_v56 = vpack.c.bf16 %v29_v53, %v25_v52 }
   0x6   :  { %v44_v13 = vld [vmem:[%s3273_s1 + $0xa8] sm:$0xff]  ;;  %1818 = vmatpush1.bf16.msra.mxu1 %v2536_v8  ;;  %1882 = vmatpush1.bf16.msra.mxu0 %v2536_v8  ;;  %v43_v17 = vld [vmem:[%s3273_s1 + $0xa0] sm:$0xff]  ;;  %v38_v55 = vld [vmem:[%s3273_s1 + $0x78] sm:$0xff] }
   0x7   :  { %1820 = vmatprep.subr.bf16.mxu1 %v2538_v9  ;;  %v2559_v15 = vpack.c.bf16 %v44_v13, %v40_v12  ;;  %1884 = vmatprep.subr.bf16.mxu0 %v2538_v9  ;;  %v48_v18 = vld [vmem:[%s3273_s1 + $0xc8] sm:$0xff]  ;;  %v2575_v20 = vpack.c.bf16 %v43_v17, %v39_v16  ;;  %v47_v22 = vld [vmem:[%s3273_s1 + $0xc0] sm:$0xff]  ;;  %v2699_v57 = vpack.c.bf16 %v38_v55, %v34_v54  ;;  %v33_v58 = vld [vmem:[%s3273_s1 + $0x50] sm:$0xff] }
   0x8   :  { %v52_v19 = vld [vmem:[%s3273_s1 + $0xe8] sm:$0xff]  ;;  %v51_v23 = vld [vmem:[%s3273_s1 + $0xe0] sm:$0xff]  ;;  %v37_v59 = vld [vmem:[%s3273_s1 + $0x70] sm:$0xff] }
   0x9   :  { %v2579_v21 = vpack.c.bf16 %v52_v19, %v48_v18  ;;  %v56_v24 = vld [vmem:[%s3273_s1 + $0x108] sm:$0xff]  ;;  %v2595_v26 = vpack.c.bf16 %v51_v23, %v47_v22  ;;  %v55_v28 = vld [vmem:[%s3273_s1 + $0x100] sm:$0xff]  ;;  %v42_v60 = vld [vmem:[%s3273_s1 + $0x98] sm:$0xff]  ;;  %v2716_v62 = vpack.c.bf16 %v37_v59, %v33_v58 }
   0xa   :  { %1822 = vmatpush1.bf16.msra.mxu1 %v2555_v14  ;;  %1886 = vmatpush1.bf16.msra.mxu0 %v2555_v14  ;;  %v60_v25 = vld [vmem:[%s3273_s1 + $0x128] sm:$0xff]  ;;  %v59_v29 = vld [vmem:[%s3273_s1 + $0x120] sm:$0xff]  ;;  %v46_v61 = vld [vmem:[%s3273_s1 + $0xb8] sm:$0xff] }
   0xb   :  { %1824 = vmatprep.subr.bf16.mxu1 %v2559_v15  ;;  %1888 = vmatprep.subr.bf16.mxu0 %v2559_v15  ;;  %v2599_v27 = vpack.c.bf16 %v60_v25, %v56_v24  ;;  %v64_v30 = vld [vmem:[%s3273_s1 + $0x148] sm:$0xff]  ;;  %v2615_v32 = vpack.c.bf16 %v59_v29, %v55_v28  ;;  %v63_v34 = vld [vmem:[%s3273_s1 + $0x140] sm:$0xff]  ;;  %v2720_v63 = vpack.c.bf16 %v46_v61, %v42_v60  ;;  %v41_v0 = vld [vmem:[%s3273_s1 + $0x90] sm:$0xff] }
   0xc   :  { %v68_v31 = vld [vmem:[%s3273_s1 + $0x168] sm:$0xff]  ;;  %v67_v35 = vld [vmem:[%s3273_s1 + $0x160] sm:$0xff]  ;;  %v45_v1 = vld [vmem:[%s3273_s1 + $0xb0] sm:$0xff] }
   0xd   :  { %v2619_v33 = vpack.c.bf16 %v68_v31, %v64_v30  ;;  %v72_v36 = vld [vmem:[%s3273_s1 + $0x188] sm:$0xff]  ;;  %v2635_v38 = vpack.c.bf16 %v67_v35, %v63_v34  ;;  %v71_v40 = vld [vmem:[%s3273_s1 + $0x180] sm:$0xff]  ;;  %v50_v2 = vld [vmem:[%s3273_s1 + $0xd8] sm:$0xff]  ;;  %v2735_v6 = vpack.c.bf16 %v45_v1, %v41_v0 }
   0xe   :  { %1826 = vmatpush1.bf16.msra.mxu1 %v2575_v20  ;;  %1890 = vmatpush1.bf16.msra.mxu0 %v2575_v20  ;;  %v76_v37 = vld [vmem:[%s3273_s1 + $0x1a8] sm:$0xff]  ;;  %v75_v41 = vld [vmem:[%s3273_s1 + $0x1a0] sm:$0xff]  ;;  %v54_v5 = vld [vmem:[%s3273_s1 + $0xf8] sm:$0xff] }
   0xf   :  { %1828 = vmatprep.subr.bf16.mxu1 %v2579_v21  ;;  %1892 = vmatprep.subr.bf16.mxu0 %v2579_v21  ;;  %v2639_v39 = vpack.c.bf16 %v76_v37, %v72_v36  ;;  %v80_v42 = vld [vmem:[%s3273_s1 + $0x1c8] sm:$0xff]  ;;  %v2655_v44 = vpack.c.bf16 %v75_v41, %v71_v40  ;;  %v79_v46 = vld [vmem:[%s3273_s1 + $0x1c0] sm:$0xff]  ;;  %v2738_v7 = vpack.c.bf16 %v54_v5, %v50_v2  ;;  %v49_v10 = vld [vmem:[%s3273_s1 + $0xd0] sm:$0xff] }
  0x10   :  { %v84_v43 = vld [vmem:[%s3273_s1 + $0x1e8] sm:$0xff]  ;;  %v83_v47 = vld [vmem:[%s3273_s1 + $0x1e0] sm:$0xff]  ;;  %v53_v11 = vld [vmem:[%s3273_s1 + $0xf0] sm:$0xff] }
  0x11   :  { %v2659_v45 = vpack.c.bf16 %v84_v43, %v80_v42  ;;  %v2675_v50 = vpack.c.bf16 %v83_v47, %v79_v46  ;;  %v58_v12 = vld [vmem:[%s3273_s1 + $0x118] sm:$0xff]  ;;  %v2753_v16 = vpack.c.bf16 %v53_v11, %v49_v10  ;;  %v57_v18 = vld [vmem:[%s3273_s1 + $0x110] sm:$0xff]  ;;  %v110_v53 = vld [vmem:[%s3274_s0 + $0x8] sm:$0xff] }
  0x12   :  { %1830 = vmatpush1.bf16.msra.mxu1 %v2595_v26  ;;  %1894 = vmatpush1.bf16.msra.mxu0 %v2595_v26  ;;  %v62_v13 = vld [vmem:[%s3273_s1 + $0x138] sm:$0xff]  ;;  %v61_v19 = vld [vmem:[%s3273_s1 + $0x130] sm:$0xff]  ;;  %v109_v54 = vld [vmem:[%s3274_s0] sm:$0xff] }
  0x13   :  { %1832 = vmatprep.subr.bf16.mxu1 %v2599_v27  ;;  %1896 = vmatprep.subr.bf16.mxu0 %v2599_v27  ;;  %v2756_v17 = vpack.c.bf16 %v62_v13, %v58_v12  ;;  %v66_v22 = vld [vmem:[%s3273_s1 + $0x158] sm:$0xff]  ;;  %v2771_v24 = vpack.c.bf16 %v61_v19, %v57_v18  ;;  %v65_v28 = vld [vmem:[%s3273_s1 + $0x150] sm:$0xff] }
  0x14   :  { %v70_v23 = vld [vmem:[%s3273_s1 + $0x178] sm:$0xff]  ;;  %v69_v29 = vld [vmem:[%s3273_s1 + $0x170] sm:$0xff] }
  0x15   :  { %v2774_v25 = vpack.c.bf16 %v70_v23, %v66_v22  ;;  %v74_v30 = vld [vmem:[%s3273_s1 + $0x198] sm:$0xff]  ;;  %v2789_v34 = vpack.c.bf16 %v69_v29, %v65_v28  ;;  %v73_v36 = vld [vmem:[%s3273_s1 + $0x190] sm:$0xff] }
  0x16   :  { %1834 = vmatpush1.bf16.msra.mxu1 %v2615_v32  ;;  %1898 = vmatpush1.bf16.msra.mxu0 %v2615_v32  ;;  %v78_v31 = vld [vmem:[%s3273_s1 + $0x1b8] sm:$0xff]  ;;  %v77_v37 = vld [vmem:[%s3273_s1 + $0x1b0] sm:$0xff] }
  0x17   :  { %1836 = vmatprep.subr.bf16.mxu1 %v2619_v33  ;;  %1900 = vmatprep.subr.bf16.mxu0 %v2619_v33  ;;  %v2792_v35 = vpack.c.bf16 %v78_v31, %v74_v30  ;;  %v82_v40 = vld [vmem:[%s3273_s1 + $0x1d8] sm:$0xff]  ;;  %v2807_v42 = vpack.c.bf16 %v77_v37, %v73_v36  ;;  %v81_v46 = vld [vmem:[%s3273_s1 + $0x1d0] sm:$0xff] }
  0x18   :  { %v86_v41 = vld [vmem:[%s3273_s1 + $0x1f8] sm:$0xff]  ;;  %v85_v47 = vld [vmem:[%s3273_s1 + $0x1f0] sm:$0xff] }
  0x19   :  { %v2810_v43 = vpack.c.bf16 %v86_v41, %v82_v40  ;;  %v2819_v48 = vpack.c.bf16 %v85_v47, %v81_v46  ;;  %v111_v5 = vld [vmem:[%s3274_s0 + $0x10] sm:$0xff]  ;;  %v112_v10 = vld [vmem:[%s3274_s0 + $0x18] sm:$0xff]  ;;  %v1697_v47 = vld [vmem:[%s3274_s0 + $0x20] sm:$0xff] }
  0x1a   :  { %1838 = vmatpush1.bf16.msra.mxu1 %v2635_v38  ;;  %1902 = vmatpush1.bf16.msra.mxu0 %v2635_v38 }
  0x1b   :  { %1840 = vmatprep.subr.bf16.mxu1 %v2639_v39  ;;  %1904 = vmatprep.subr.bf16.mxu0 %v2639_v39 }
  0x1e   :  { %1842 = vmatpush1.bf16.msra.mxu1 %v2655_v44  ;;  %1906 = vmatpush1.bf16.msra.mxu0 %v2655_v44 }
  0x1f   :  { %1844 = vmatprep.subr.bf16.mxu1 %v2659_v45  ;;  %1908 = vmatprep.subr.bf16.mxu0 %v2659_v45 }
  0x22   :  { %1846 = vmatpush1.bf16.msra.mxu1 %v2675_v50  ;;  %1910 = vmatpush1.bf16.msra.mxu0 %v2675_v50 }
  0x23   :  { %1848 = vmatprep.subr.bf16.mxu1 %v2679_v51  ;;  %1944 = vmatprep.subr.bf16.mxu0 %v2525_v4 }
  0x25   :  { %178 = vmatmul.mubr.f32.vlgmr.msra.gmra.mrb[0].mxu1 %v2488_v3 }
  0x26   :  { %1850 = vmatpush1.bf16.msra.mxu1 %v2695_v56  ;;  %248 = vmatprep.mubr.f32.mxu1 %v2488_v3 }
  0x27   :  { %1852 = vmatprep.subr.bf16.mxu1 %v2699_v57 }
  0x2a   :  { %1854 = vmatpush1.bf16.msra.mxu1 %v2716_v62 }
  0x2b   :  { %1856 = vmatprep.subr.bf16.mxu1 %v2720_v63 }
  0x2e   :  { %1858 = vmatpush1.bf16.msra.mxu1 %v2735_v6 }
  0x2f   :  { %1860 = vmatprep.subr.bf16.mxu1 %v2738_v7 }
  0x32   :  { %1862 = vmatpush1.bf16.msra.mxu1 %v2753_v16 }
  0x33   :  { %1864 = vmatprep.subr.bf16.mxu1 %v2756_v17 }
  0x36   :  { %1866 = vmatpush1.bf16.msra.mxu1 %v2771_v24 }
  0x37   :  { %1868 = vmatprep.subr.bf16.mxu1 %v2774_v25 }
  0x3a   :  { %1870 = vmatpush1.bf16.msra.mxu1 %v2789_v34 }
  0x3b   :  { %1872 = vmatprep.subr.bf16.mxu1 %v2792_v35 }
  0x3e   :  { %1874 = vmatpush1.bf16.msra.mxu1 %v2807_v42 }
  0x3f   :  { %1876 = vmatprep.subr.bf16.mxu1 %v2810_v43 }
  0x42   :  { %1878 = vmatpush1.bf16.msra.mxu1 %v2819_v48 }
  0x43   :  { %1912 = vmatprep.subr.bf16.mxu1 %v2679_v51 }
  0x45   :  { %249 = vmatmul.mubr.f32.vlgmr.msra.gmra.mrb[2].mxu1 %v2488_v3 }
  0x46   :  { %1914 = vmatpush1.bf16.msra.mxu1 %v2695_v56  ;;  %427 = vmatprep.mubr.f32.mxu1 %v2488_v3 }
  0x47   :  { %1916 = vmatprep.subr.bf16.mxu1 %v2699_v57 }
  0x4a   :  { %1918 = vmatpush1.bf16.msra.mxu1 %v2716_v62 }
  0x4b   :  { %1920 = vmatprep.subr.bf16.mxu1 %v2720_v63 }
  0x4e   :  { %1922 = vmatpush1.bf16.msra.mxu1 %v2735_v6 }
  0x4f   :  { %1924 = vmatprep.subr.bf16.mxu1 %v2738_v7 }
  0x52   :  { %1926 = vmatpush1.bf16.msra.mxu1 %v2753_v16 }
  0x53   :  { %1928 = vmatprep.subr.bf16.mxu1 %v2756_v17 }
  0x56   :  { %1930 = vmatpush1.bf16.msra.mxu1 %v2771_v24 }
  0x57   :  { %1932 = vmatprep.subr.bf16.mxu1 %v2774_v25 }
  0x5a   :  { %1934 = vmatpush1.bf16.msra.mxu1 %v2789_v34 }
  0x5b   :  { %1936 = vmatprep.subr.bf16.mxu1 %v2792_v35 }
  0x5e   :  { %1938 = vmatpush1.bf16.msra.mxu1 %v2807_v42 }
  0x5f   :  { %1940 = vmatprep.subr.bf16.mxu1 %v2810_v43 }
  0x62   :  { %1942 = vmatpush1.bf16.msra.mxu1 %v2819_v48 }
  0x63   :  { %1976 = vmatprep.subr.bf16.mxu1 %v2679_v51 }
  0xf8   :  { %v179_v49 = vpop.f32.mrb[0].mxu1 }
  0xf9   :  { %v181_v52 = vpop.f32.mrb[1].mxu1  ;;  %v255_v58 = vadd.f32 %v179_v49, %v109_v54  ;;  %v1698_v49 = vld [vmem:[%s3274_s0 + $0x28] sm:$0xff] }
  0xfa   :  { %v256_v55 = vadd.f32 %v181_v52, %v110_v53 }
  0xfb   :  { %v1694_v60 = vmul.f32 -1.442695, %v255_v58 }
  0xfc   :  { %v1695_v59 = vmul.f32 -1.442695, %v256_v55 }
  0xfe   :  { %2360 = vpow2.f32 %v1695_v59 }
  0xff   :  { %2362 = vpow2.f32 %v1694_v60 }
 0x108   :  { %v2361_v61 = vpop.eup %2360 }
 0x109   :  { %v2363_v0 = vpop.eup %2362  ;;  %v268_v1 = vadd.f32 1.0, %v2361_v61 }
 0x10a   :  { %v262_v2 = vadd.f32 1.0, %v2363_v0  ;;  %v1700_v0 = vld [vmem:[%s3274_s0 + $0x38] sm:$0xff] }
 0x10b   :  { %2364 = vrcp.f32 %v268_v1 }
 0x10c   :  { %2366 = vrcp.f32 %v262_v2  ;;  %v1699_v2 = vld [vmem:[%s3274_s0 + $0x30] sm:$0xff] }
 0x115   :  { %v2365_v22 = vpop.eup %2364 }
 0x116   :  { %v2367_v23 = vpop.eup %2366  ;;  %v278_v29 = vmul.f32 0.0, %v2365_v22 }
 0x118   :  { %v250_v11 = vpop.f32.mrb[2].mxu1 }
 0x119   :  { %v257_v12 = vadd.f32 %v250_v11, %v111_v5  ;;  %v252_v13 = vpop.f32.mrb[3].mxu1 }
 0x11a   :  { %v258_v18 = vadd.f32 %v252_v13, %v112_v10 }
 0x11b   :  { %2368 = vtanh.f32 %v257_v12 }
 0x11c   :  { %v1696_v19 = vmul.f32 -1.442695, %v258_v18 }
 0x11e   :  { %2370 = vpow2.f32 %v1696_v19 }
 0x125   :  { %v2369_v28 = vpop.eup %2368 }
 0x126   :  { %v279_v30 = vmul.f32 %v2369_v28, %v2367_v23 }
 0x128   :  { %v2371_v31 = vpop.eup %2370  ;;  %v2854_v36 = vadd.f32 %v279_v30, %v278_v29 }
 0x129   :  { %v275_v37 = vadd.f32 1.0, %v2371_v31 }
 0x12a   :  { %2372 = vtanh.f32 %v2854_v36 }
 0x12b   :  { %2374 = vrcp.f32 %v275_v37 }
 0x134   :  { %v2373_v40 = vpop.eup %2372 }
 0x135   :  { %v2375_v41 = vpop.eup %2374 }
 0x136   :  { %v2857_v46 = vmul.f32 %v2375_v41, %v2373_v40 }
 0x138   :  { %357 = vmatmul.mubr.f32.vlgmr.msra.gmra.mrb[0].mxu0 %v2857_v46  ;;  %428 = vmatmul.mubr.f32.vlgmr.msra.gmra.mrb[4].mxu1 %v2857_v46 }
 0x139   :  { %1946 = vmatpush1.bf16.msra.mxu0 %v2536_v8  ;;  %1978 = vmatpush1.bf16.msra.mxu1 %v2695_v56 }
 0x13a   :  { %1948 = vmatprep.subr.bf16.mxu0 %v2538_v9  ;;  %1980 = vmatprep.subr.bf16.mxu1 %v2699_v57 }
 0x13b   :  { %536 = vmatprep.mubr.f32.mxu0 %v2488_v3  ;;  %607 = vmatprep.mubr.f32.mxu1 %v2488_v3 }
 0x13d   :  { %1950 = vmatpush1.bf16.msra.mxu0 %v2555_v14  ;;  %1982 = vmatpush1.bf16.msra.mxu1 %v2716_v62 }
 0x13e   :  { %1952 = vmatprep.subr.bf16.mxu0 %v2559_v15  ;;  %1984 = vmatprep.subr.bf16.mxu1 %v2720_v63 }
 0x141   :  { %1954 = vmatpush1.bf16.msra.mxu0 %v2575_v20  ;;  %1986 = vmatpush1.bf16.msra.mxu1 %v2735_v6 }
 0x142   :  { %1956 = vmatprep.subr.bf16.mxu0 %v2579_v21  ;;  %1988 = vmatprep.subr.bf16.mxu1 %v2738_v7 }
 0x145   :  { %1958 = vmatpush1.bf16.msra.mxu0 %v2595_v26  ;;  %1990 = vmatpush1.bf16.msra.mxu1 %v2753_v16 }
 0x146   :  { %1960 = vmatprep.subr.bf16.mxu0 %v2599_v27  ;;  %1992 = vmatprep.subr.bf16.mxu1 %v2756_v17 }
 0x149   :  { %1962 = vmatpush1.bf16.msra.mxu0 %v2615_v32  ;;  %1994 = vmatpush1.bf16.msra.mxu1 %v2771_v24 }
 0x14a   :  { %1964 = vmatprep.subr.bf16.mxu0 %v2619_v33  ;;  %1996 = vmatprep.subr.bf16.mxu1 %v2774_v25 }
 0x14d   :  { %1966 = vmatpush1.bf16.msra.mxu0 %v2635_v38  ;;  %1998 = vmatpush1.bf16.msra.mxu1 %v2789_v34 }
 0x14e   :  { %1968 = vmatprep.subr.bf16.mxu0 %v2639_v39  ;;  %2000 = vmatprep.subr.bf16.mxu1 %v2792_v35 }
 0x151   :  { %1970 = vmatpush1.bf16.msra.mxu0 %v2655_v44  ;;  %2002 = vmatpush1.bf16.msra.mxu1 %v2807_v42 }
 0x152   :  { %1972 = vmatprep.subr.bf16.mxu0 %v2659_v45  ;;  %2004 = vmatprep.subr.bf16.mxu1 %v2810_v43 }
 0x155   :  { %1974 = vmatpush1.bf16.msra.mxu0 %v2675_v50  ;;  %2006 = vmatpush1.bf16.msra.mxu1 %v2819_v48 }
 0x156   :  { %2008 = vmatprep.subr.bf16.mxu0 %v2525_v4  ;;  %2040 = vmatprep.subr.bf16.mxu1 %v2679_v51 }
 0x20b   :  { %v358_v52 = vpop.f32.mrb[0].mxu0  ;;  %v429_v53 = vpop.f32.mrb[4].mxu1 }
 0x20c   :  { %v434_v54 = vadd.f32 %v1697_v47, %v358_v52  ;;  %v360_v55 = vpop.f32.mrb[1].mxu0  ;;  %v431_v58 = vpop.f32.mrb[5].mxu1  ;;  %v436_v10 = vadd.f32 %v1699_v2, %v429_v53  ;;  %v1706_v2 = vld [vmem:[%s3274_s0 + $0x50] sm:$0xff] }
 0x20d   :  { %v435_v59 = vadd.f32 %v1698_v49, %v360_v55  ;;  %v437_v1 = vadd.f32 %v1700_v0, %v431_v58  ;;  %v1705_v49 = vld [vmem:[%s3274_s0 + $0x48] sm:$0xff]  ;;  %v1707_v0 = vld [vmem:[%s3274_s0 + $0x58] sm:$0xff] }
 0x20e   :  { %v1701_v60 = vmul.f32 -1.442695, %v434_v54 }
 0x20f   :  { %v1702_v61 = vmul.f32 -1.442695, %v435_v59  ;;  %v1703_v5 = vmul.f32 -1.442695, %v437_v1 }
 0x210   :  { %2376 = vpow2.f32 %v1701_v60 }
 0x211   :  { %2378 = vpow2.f32 %v1702_v61 }
 0x212   :  { %2380 = vpow2.f32 %v1703_v5 }
 0x213   :  { %2382 = vtanh.f32 %v436_v10 }
 0x21a   :  { %v2377_v11 = vpop.eup %2376 }
 0x21b   :  { %v2379_v12 = vpop.eup %2378  ;;  %v441_v13 = vadd.f32 1.0, %v2377_v11 }
 0x21c   :  { %v447_v18 = vadd.f32 1.0, %v2379_v12  ;;  %v2381_v19 = vpop.eup %2380 }
 0x21d   :  { %2384 = vrcp.f32 %v441_v13  ;;  %v2383_v22 = vpop.eup %2382  ;;  %v454_v30 = vadd.f32 1.0, %v2381_v19 }
 0x21e   :  { %2386 = vrcp.f32 %v447_v18 }
 0x21f   :  { %2388 = vrcp.f32 %v454_v30 }
 0x227   :  { %v2385_v23 = vpop.eup %2384 }
 0x228   :  { %v2387_v28 = vpop.eup %2386  ;;  %v458_v29 = vmul.f32 %v2385_v23, %v2383_v22 }
 0x229   :  { %v457_v31 = vmul.f32 %v2387_v28, %v2854_v36  ;;  %v2389_v40 = vpop.eup %2388  ;;  %v1704_v36 = vld [vmem:[%s3274_s0 + $0x40] sm:$0xff] }
 0x22b   :  { %v2908_v37 = vadd.f32 %v458_v29, %v457_v31 }
 0x22d   :  { %2390 = vtanh.f32 %v2908_v37 }
 0x237   :  { %v2391_v41 = vpop.eup %2390 }
 0x238   :  { %v2911_v47 = vmul.f32 %v2391_v41, %v2389_v40 }
 0x23a   :  { %537 = vmatmul.mubr.f32.vlgmr.msra.gmra.mrb[2].mxu0 %v2911_v47  ;;  %608 = vmatmul.mubr.f32.vlgmr.msra.gmra.mrb[6].mxu1 %v2911_v47 }
 0x23b   :  { %2010 = vmatpush1.bf16.msra.mxu0 %v2536_v8  ;;  %2042 = vmatpush1.bf16.msra.mxu1 %v2695_v56 }
 0x23c   :  { %2012 = vmatprep.subr.bf16.mxu0 %v2538_v9  ;;  %2044 = vmatprep.subr.bf16.mxu1 %v2699_v57 }
 0x23d   :  { %716 = vmatprep.mubr.f32.mxu0 %v2488_v3  ;;  %787 = vmatprep.mubr.f32.mxu1 %v2488_v3 }
 0x23f   :  { %2014 = vmatpush1.bf16.msra.mxu0 %v2555_v14  ;;  %2046 = vmatpush1.bf16.msra.mxu1 %v2716_v62 }
 0x240   :  { %2016 = vmatprep.subr.bf16.mxu0 %v2559_v15  ;;  %2048 = vmatprep.subr.bf16.mxu1 %v2720_v63 }
 0x243   :  { %2018 = vmatpush1.bf16.msra.mxu0 %v2575_v20  ;;  %2050 = vmatpush1.bf16.msra.mxu1 %v2735_v6 }
 0x244   :  { %2020 = vmatprep.subr.bf16.mxu0 %v2579_v21  ;;  %2052 = vmatprep.subr.bf16.mxu1 %v2738_v7 }
 0x247   :  { %2022 = vmatpush1.bf16.msra.mxu0 %v2595_v26  ;;  %2054 = vmatpush1.bf16.msra.mxu1 %v2753_v16 }
 0x248   :  { %2024 = vmatprep.subr.bf16.mxu0 %v2599_v27  ;;  %2056 = vmatprep.subr.bf16.mxu1 %v2756_v17 }
 0x24b   :  { %2026 = vmatpush1.bf16.msra.mxu0 %v2615_v32  ;;  %2058 = vmatpush1.bf16.msra.mxu1 %v2771_v24 }
 0x24c   :  { %2028 = vmatprep.subr.bf16.mxu0 %v2619_v33  ;;  %2060 = vmatprep.subr.bf16.mxu1 %v2774_v25 }
 0x24f   :  { %2030 = vmatpush1.bf16.msra.mxu0 %v2635_v38  ;;  %2062 = vmatpush1.bf16.msra.mxu1 %v2789_v34 }
 0x250   :  { %2032 = vmatprep.subr.bf16.mxu0 %v2639_v39  ;;  %2064 = vmatprep.subr.bf16.mxu1 %v2792_v35 }
 0x253   :  { %2034 = vmatpush1.bf16.msra.mxu0 %v2655_v44  ;;  %2066 = vmatpush1.bf16.msra.mxu1 %v2807_v42 }
 0x254   :  { %2036 = vmatprep.subr.bf16.mxu0 %v2659_v45  ;;  %2068 = vmatprep.subr.bf16.mxu1 %v2810_v43 }
 0x257   :  { %2038 = vmatpush1.bf16.msra.mxu0 %v2675_v50  ;;  %2070 = vmatpush1.bf16.msra.mxu1 %v2819_v48 }
 0x258   :  { %2072 = vmatprep.subr.bf16.mxu0 %v2525_v4  ;;  %2104 = vmatprep.subr.bf16.mxu1 %v2679_v51 }
 0x30d   :  { %v538_v52 = vpop.f32.mrb[2].mxu0  ;;  %v609_v53 = vpop.f32.mrb[6].mxu1 }
 0x30e   :  { %v614_v54 = vadd.f32 %v1704_v36, %v538_v52  ;;  %v540_v55 = vpop.f32.mrb[3].mxu0  ;;  %v611_v58 = vpop.f32.mrb[7].mxu1  ;;  %v616_v10 = vadd.f32 %v1706_v2, %v609_v53  ;;  %v1712_v52 = vld [vmem:[%s3274_s0 + $0x68] sm:$0xff] }
 0x30f   :  { %v615_v59 = vadd.f32 %v1705_v49, %v540_v55  ;;  %v617_v1 = vadd.f32 %v1707_v0, %v611_v58 }
 0x310   :  { %v1708_v60 = vmul.f32 -1.442695, %v614_v54 }
 0x311   :  { %v1709_v61 = vmul.f32 -1.442695, %v615_v59  ;;  %v1710_v5 = vmul.f32 -1.442695, %v617_v1  ;;  %v1714_v1 = vld [vmem:[%s3274_s0 + $0x78] sm:$0xff] }
 0x312   :  { %2392 = vpow2.f32 %v1708_v60 }
 0x313   :  { %2394 = vpow2.f32 %v1709_v61 }
 0x314   :  { %2396 = vpow2.f32 %v1710_v5  ;;  %v1713_v5 = vld [vmem:[%s3274_s0 + $0x70] sm:$0xff] }
 0x315   :  { %2398 = vtanh.f32 %v616_v10 }
 0x31c   :  { %v2393_v11 = vpop.eup %2392 }
 0x31d   :  { %v2395_v12 = vpop.eup %2394  ;;  %v621_v13 = vadd.f32 1.0, %v2393_v11 }
 0x31e   :  { %v627_v18 = vadd.f32 1.0, %v2395_v12  ;;  %v2397_v19 = vpop.eup %2396 }
 0x31f   :  { %2400 = vrcp.f32 %v621_v13  ;;  %v2399_v22 = vpop.eup %2398  ;;  %v634_v30 = vadd.f32 1.0, %v2397_v19 }
 0x320   :  { %2402 = vrcp.f32 %v627_v18 }
 0x321   :  { %2404 = vrcp.f32 %v634_v30 }
 0x329   :  { %v2401_v23 = vpop.eup %2400 }
 0x32a   :  { %v2403_v28 = vpop.eup %2402  ;;  %v638_v29 = vmul.f32 %v2401_v23, %v2399_v22 }
 0x32b   :  { %v637_v31 = vmul.f32 %v2403_v28, %v2908_v37  ;;  %v2405_v41 = vpop.eup %2404  ;;  %v1711_v37 = vld [vmem:[%s3274_s0 + $0x60] sm:$0xff] }
 0x32d   :  { %v2962_v40 = vadd.f32 %v638_v29, %v637_v31 }
 0x32f   :  { %2406 = vtanh.f32 %v2962_v40 }
 0x339   :  { %v2407_v36 = vpop.eup %2406 }
 0x33a   :  { %v2965_v49 = vmul.f32 %v2407_v36, %v2405_v41 }
 0x33c   :  { %717 = vmatmul.mubr.f32.vlgmr.msra.gmra.mrb[4].mxu0 %v2965_v49  ;;  %788 = vmatmul.mubr.f32.vlgmr.msra.gmra.mrb[8].mxu1 %v2965_v49 }
 0x33d   :  { %2074 = vmatpush1.bf16.msra.mxu0 %v2536_v8  ;;  %2106 = vmatpush1.bf16.msra.mxu1 %v2695_v56 }
 0x33e   :  { %2076 = vmatprep.subr.bf16.mxu0 %v2538_v9  ;;  %2108 = vmatprep.subr.bf16.mxu1 %v2699_v57 }
 0x33f   :  { %896 = vmatprep.mubr.f32.mxu0 %v2488_v3  ;;  %967 = vmatprep.mubr.f32.mxu1 %v2488_v3 }
 0x341   :  { %2078 = vmatpush1.bf16.msra.mxu0 %v2555_v14  ;;  %2110 = vmatpush1.bf16.msra.mxu1 %v2716_v62 }
 0x342   :  { %2080 = vmatprep.subr.bf16.mxu0 %v2559_v15  ;;  %2112 = vmatprep.subr.bf16.mxu1 %v2720_v63 }
 0x345   :  { %2082 = vmatpush1.bf16.msra.mxu0 %v2575_v20  ;;  %2114 = vmatpush1.bf16.msra.mxu1 %v2735_v6 }
 0x346   :  { %2084 = vmatprep.subr.bf16.mxu0 %v2579_v21  ;;  %2116 = vmatprep.subr.bf16.mxu1 %v2738_v7 }
 0x349   :  { %2086 = vmatpush1.bf16.msra.mxu0 %v2595_v26  ;;  %2118 = vmatpush1.bf16.msra.mxu1 %v2753_v16 }
 0x34a   :  { %2088 = vmatprep.subr.bf16.mxu0 %v2599_v27  ;;  %2120 = vmatprep.subr.bf16.mxu1 %v2756_v17 }
 0x34d   :  { %2090 = vmatpush1.bf16.msra.mxu0 %v2615_v32  ;;  %2122 = vmatpush1.bf16.msra.mxu1 %v2771_v24 }
 0x34e   :  { %2092 = vmatprep.subr.bf16.mxu0 %v2619_v33  ;;  %2124 = vmatprep.subr.bf16.mxu1 %v2774_v25 }
 0x351   :  { %2094 = vmatpush1.bf16.msra.mxu0 %v2635_v38  ;;  %2126 = vmatpush1.bf16.msra.mxu1 %v2789_v34 }
 0x352   :  { %2096 = vmatprep.subr.bf16.mxu0 %v2639_v39  ;;  %2128 = vmatprep.subr.bf16.mxu1 %v2792_v35 }
 0x355   :  { %2098 = vmatpush1.bf16.msra.mxu0 %v2655_v44  ;;  %2130 = vmatpush1.bf16.msra.mxu1 %v2807_v42 }
 0x356   :  { %2100 = vmatprep.subr.bf16.mxu0 %v2659_v45  ;;  %2132 = vmatprep.subr.bf16.mxu1 %v2810_v43 }
 0x359   :  { %2102 = vmatpush1.bf16.msra.mxu0 %v2675_v50  ;;  %2134 = vmatpush1.bf16.msra.mxu1 %v2819_v48 }
 0x35a   :  { %2136 = vmatprep.subr.bf16.mxu0 %v2525_v4  ;;  %2168 = vmatprep.subr.bf16.mxu1 %v2679_v51 }
 0x40f   :  { %v718_v53 = vpop.f32.mrb[4].mxu0  ;;  %v789_v54 = vpop.f32.mrb[8].mxu1 }
 0x410   :  { %v794_v55 = vadd.f32 %v1711_v37, %v718_v53  ;;  %v720_v58 = vpop.f32.mrb[5].mxu0  ;;  %v791_v59 = vpop.f32.mrb[9].mxu1  ;;  %v796_v11 = vadd.f32 %v1713_v5, %v789_v54  ;;  %v1719_v54 = vld [vmem:[%s3274_s0 + $0x88] sm:$0xff]  ;;  %v1721_v5 = vld [vmem:[%s3274_s0 + $0x98] sm:$0xff] }
 0x411   :  { %v795_v60 = vadd.f32 %v1712_v52, %v720_v58  ;;  %v797_v2 = vadd.f32 %v1714_v1, %v791_v59 }
 0x412   :  { %v1715_v61 = vmul.f32 -1.442695, %v794_v55 }
 0x413   :  { %v1716_v0 = vmul.f32 -1.442695, %v795_v60  ;;  %v1717_v10 = vmul.f32 -1.442695, %v797_v2 }
 0x414   :  { %2408 = vpow2.f32 %v1715_v61 }
 0x415   :  { %2410 = vpow2.f32 %v1716_v0 }
 0x416   :  { %2412 = vpow2.f32 %v1717_v10 }
 0x417   :  { %2414 = vtanh.f32 %v796_v11  ;;  %v1720_v11 = vld [vmem:[%s3274_s0 + $0x90] sm:$0xff] }
 0x41e   :  { %v2409_v12 = vpop.eup %2408 }
 0x41f   :  { %v2411_v13 = vpop.eup %2410  ;;  %v801_v18 = vadd.f32 1.0, %v2409_v12 }
 0x420   :  { %v807_v19 = vadd.f32 1.0, %v2411_v13  ;;  %v2413_v22 = vpop.eup %2412 }
 0x421   :  { %2416 = vrcp.f32 %v801_v18  ;;  %v2415_v23 = vpop.eup %2414  ;;  %v814_v31 = vadd.f32 1.0, %v2413_v22 }
 0x422   :  { %2418 = vrcp.f32 %v807_v19 }
 0x423   :  { %2420 = vrcp.f32 %v814_v31 }
 0x42b   :  { %v2417_v28 = vpop.eup %2416 }
 0x42c   :  { %v2419_v29 = vpop.eup %2418  ;;  %v818_v30 = vmul.f32 %v2417_v28, %v2415_v23 }
 0x42d   :  { %v817_v41 = vmul.f32 %v2419_v29, %v2962_v40  ;;  %v2421_v37 = vpop.eup %2420  ;;  %v1718_v40 = vld [vmem:[%s3274_s0 + $0x80] sm:$0xff] }
 0x42f   :  { %v3016_v36 = vadd.f32 %v818_v30, %v817_v41 }
 0x431   :  { %2422 = vtanh.f32 %v3016_v36 }
 0x43b   :  { %v2423_v52 = vpop.eup %2422 }
 0x43c   :  { %v3019_v53 = vmul.f32 %v2423_v52, %v2421_v37 }
 0x43e   :  { %897 = vmatmul.mubr.f32.vlgmr.msra.gmra.mrb[6].mxu0 %v3019_v53  ;;  %968 = vmatmul.mubr.f32.vlgmr.msra.gmra.mrb[10].mxu1 %v3019_v53 }
 0x43f   :  { %2138 = vmatpush1.bf16.msra.mxu0 %v2536_v8  ;;  %2170 = vmatpush1.bf16.msra.mxu1 %v2695_v56 }
 0x440   :  { %2140 = vmatprep.subr.bf16.mxu0 %v2538_v9  ;;  %2172 = vmatprep.subr.bf16.mxu1 %v2699_v57 }
 0x441   :  { %1076 = vmatprep.mubr.f32.mxu0 %v2488_v3  ;;  %1147 = vmatprep.mubr.f32.mxu1 %v2488_v3 }
 0x443   :  { %2142 = vmatpush1.bf16.msra.mxu0 %v2555_v14  ;;  %2174 = vmatpush1.bf16.msra.mxu1 %v2716_v62 }
 0x444   :  { %2144 = vmatprep.subr.bf16.mxu0 %v2559_v15  ;;  %2176 = vmatprep.subr.bf16.mxu1 %v2720_v63 }
 0x447   :  { %2146 = vmatpush1.bf16.msra.mxu0 %v2575_v20  ;;  %2178 = vmatpush1.bf16.msra.mxu1 %v2735_v6 }
 0x448   :  { %2148 = vmatprep.subr.bf16.mxu0 %v2579_v21  ;;  %2180 = vmatprep.subr.bf16.mxu1 %v2738_v7 }
 0x44b   :  { %2150 = vmatpush1.bf16.msra.mxu0 %v2595_v26  ;;  %2182 = vmatpush1.bf16.msra.mxu1 %v2753_v16 }
 0x44c   :  { %2152 = vmatprep.subr.bf16.mxu0 %v2599_v27  ;;  %2184 = vmatprep.subr.bf16.mxu1 %v2756_v17 }
 0x44f   :  { %2154 = vmatpush1.bf16.msra.mxu0 %v2615_v32  ;;  %2186 = vmatpush1.bf16.msra.mxu1 %v2771_v24 }
 0x450   :  { %2156 = vmatprep.subr.bf16.mxu0 %v2619_v33  ;;  %2188 = vmatprep.subr.bf16.mxu1 %v2774_v25 }
 0x453   :  { %2158 = vmatpush1.bf16.msra.mxu0 %v2635_v38  ;;  %2190 = vmatpush1.bf16.msra.mxu1 %v2789_v34 }
 0x454   :  { %2160 = vmatprep.subr.bf16.mxu0 %v2639_v39  ;;  %2192 = vmatprep.subr.bf16.mxu1 %v2792_v35 }
 0x457   :  { %2162 = vmatpush1.bf16.msra.mxu0 %v2655_v44  ;;  %2194 = vmatpush1.bf16.msra.mxu1 %v2807_v42 }
 0x458   :  { %2164 = vmatprep.subr.bf16.mxu0 %v2659_v45  ;;  %2196 = vmatprep.subr.bf16.mxu1 %v2810_v43 }
 0x45b   :  { %2166 = vmatpush1.bf16.msra.mxu0 %v2675_v50  ;;  %2198 = vmatpush1.bf16.msra.mxu1 %v2819_v48 }
 0x45c   :  { %2200 = vmatprep.subr.bf16.mxu0 %v2525_v4  ;;  %2232 = vmatprep.subr.bf16.mxu1 %v2679_v51 }
 0x511   :  { %v898_v55 = vpop.f32.mrb[6].mxu0  ;;  %v969_v58 = vpop.f32.mrb[10].mxu1 }
 0x512   :  { %v974_v59 = vadd.f32 %v1718_v40, %v898_v55  ;;  %v900_v60 = vpop.f32.mrb[7].mxu0  ;;  %v971_v61 = vpop.f32.mrb[11].mxu1  ;;  %v976_v13 = vadd.f32 %v1720_v11, %v969_v58 }
 0x513   :  { %v975_v0 = vadd.f32 %v1719_v54, %v900_v60  ;;  %v977_v10 = vadd.f32 %v1721_v5, %v971_v61 }
 0x514   :  { %v1722_v1 = vmul.f32 -1.442695, %v974_v59  ;;  %v1726_v59 = vld [vmem:[%s3274_s0 + $0xa8] sm:$0xff] }
 0x515   :  { %v1723_v2 = vmul.f32 -1.442695, %v975_v0  ;;  %v1724_v12 = vmul.f32 -1.442695, %v977_v10 }
 0x516   :  { %2424 = vpow2.f32 %v1722_v1 }
 0x517   :  { %2426 = vpow2.f32 %v1723_v2 }
 0x518   :  { %2428 = vpow2.f32 %v1724_v12  ;;  %v1727_v12 = vld [vmem:[%s3274_s0 + $0xb0] sm:$0xff] }
 0x519   :  { %2430 = vtanh.f32 %v976_v13 }
 0x520   :  { %v2425_v18 = vpop.eup %2424 }
 0x521   :  { %v2427_v19 = vpop.eup %2426  ;;  %v981_v22 = vadd.f32 1.0, %v2425_v18 }
 0x522   :  { %v987_v23 = vadd.f32 1.0, %v2427_v19  ;;  %v2429_v28 = vpop.eup %2428 }
 0x523   :  { %2432 = vrcp.f32 %v981_v22  ;;  %v2431_v29 = vpop.eup %2430  ;;  %v994_v37 = vadd.f32 1.0, %v2429_v28 }
 0x524   :  { %2434 = vrcp.f32 %v987_v23 }
 0x525   :  { %2436 = vrcp.f32 %v994_v37 }
 0x52d   :  { %v2433_v30 = vpop.eup %2432 }
 0x52e   :  { %v2435_v31 = vpop.eup %2434  ;;  %v998_v41 = vmul.f32 %v2433_v30, %v2431_v29 }
 0x52f   :  { %v997_v52 = vmul.f32 %v2435_v31, %v3016_v36  ;;  %v2437_v54 = vpop.eup %2436  ;;  %v1725_v36 = vld [vmem:[%s3274_s0 + $0xa0] sm:$0xff] }
 0x531   :  { %v3070_v40 = vadd.f32 %v998_v41, %v997_v52 }
 0x533   :  { %2438 = vtanh.f32 %v3070_v40 }
 0x53d   :  { %v2439_v55 = vpop.eup %2438 }
 0x53e   :  { %v3073_v58 = vmul.f32 %v2439_v55, %v2437_v54 }
 0x540   :  { %1077 = vmatmul.mubr.f32.vlgmr.msra.gmra.mrb[8].mxu0 %v3073_v58  ;;  %1148 = vmatmul.mubr.f32.vlgmr.msra.gmra.mrb[12].mxu1 %v3073_v58 }
 0x541   :  { %2202 = vmatpush1.bf16.msra.mxu0 %v2536_v8  ;;  %2234 = vmatpush1.bf16.msra.mxu1 %v2695_v56 }
 0x542   :  { %2204 = vmatprep.subr.bf16.mxu0 %v2538_v9  ;;  %2236 = vmatprep.subr.bf16.mxu1 %v2699_v57 }
 0x543   :  { %1256 = vmatprep.mubr.f32.mxu0 %v2488_v3  ;;  %1327 = vmatprep.mubr.f32.mxu1 %v2488_v3 }
 0x545   :  { %2206 = vmatpush1.bf16.msra.mxu0 %v2555_v14  ;;  %2238 = vmatpush1.bf16.msra.mxu1 %v2716_v62 }
 0x546   :  { %2208 = vmatprep.subr.bf16.mxu0 %v2559_v15  ;;  %2240 = vmatprep.subr.bf16.mxu1 %v2720_v63 }
 0x549   :  { %2210 = vmatpush1.bf16.msra.mxu0 %v2575_v20  ;;  %2242 = vmatpush1.bf16.msra.mxu1 %v2735_v6 }
 0x54a   :  { %2212 = vmatprep.subr.bf16.mxu0 %v2579_v21  ;;  %2244 = vmatprep.subr.bf16.mxu1 %v2738_v7 }
 0x54d   :  { %2214 = vmatpush1.bf16.msra.mxu0 %v2595_v26  ;;  %2246 = vmatpush1.bf16.msra.mxu1 %v2753_v16 }
 0x54e   :  { %2216 = vmatprep.subr.bf16.mxu0 %v2599_v27  ;;  %2248 = vmatprep.subr.bf16.mxu1 %v2756_v17 }
 0x551   :  { %2218 = vmatpush1.bf16.msra.mxu0 %v2615_v32  ;;  %2250 = vmatpush1.bf16.msra.mxu1 %v2771_v24 }
 0x552   :  { %2220 = vmatprep.subr.bf16.mxu0 %v2619_v33  ;;  %2252 = vmatprep.subr.bf16.mxu1 %v2774_v25 }
 0x555   :  { %2222 = vmatpush1.bf16.msra.mxu0 %v2635_v38  ;;  %2254 = vmatpush1.bf16.msra.mxu1 %v2789_v34 }
 0x556   :  { %2224 = vmatprep.subr.bf16.mxu0 %v2639_v39  ;;  %2256 = vmatprep.subr.bf16.mxu1 %v2792_v35 }
 0x559   :  { %2226 = vmatpush1.bf16.msra.mxu0 %v2655_v44  ;;  %2258 = vmatpush1.bf16.msra.mxu1 %v2807_v42 }
 0x55a   :  { %2228 = vmatprep.subr.bf16.mxu0 %v2659_v45  ;;  %2260 = vmatprep.subr.bf16.mxu1 %v2810_v43 }
 0x55d   :  { %2230 = vmatpush1.bf16.msra.mxu0 %v2675_v50  ;;  %2262 = vmatpush1.bf16.msra.mxu1 %v2819_v48 }
 0x55e   :  { %2264 = vmatprep.subr.bf16.mxu0 %v2525_v4  ;;  %2296 = vmatprep.subr.bf16.mxu1 %v2679_v51  ;;  %v1728_v4 = vld [vmem:[%s3274_s0 + $0xb8] sm:$0xff] }
 0x613   :  { %v1078_v60 = vpop.f32.mrb[8].mxu0  ;;  %v1149_v61 = vpop.f32.mrb[12].mxu1 }
 0x614   :  { %v1154_v0 = vadd.f32 %v1725_v36, %v1078_v60  ;;  %v1080_v1 = vpop.f32.mrb[9].mxu0  ;;  %v1151_v2 = vpop.f32.mrb[13].mxu1  ;;  %v1156_v18 = vadd.f32 %v1727_v12, %v1149_v61 }
 0x615   :  { %v1155_v5 = vadd.f32 %v1726_v59, %v1080_v1  ;;  %v1157_v51 = vadd.f32 %v1728_v4, %v1151_v2  ;;  %v93_v4 = vld [vmem:[%s3275_s2 + $0x30] sm:$0xff] }
 0x616   :  { %v1729_v10 = vmul.f32 -1.442695, %v1154_v0 }
 0x617   :  { %v1730_v11 = vmul.f32 -1.442695, %v1155_v5  ;;  %v1731_v13 = vmul.f32 -1.442695, %v1157_v51  ;;  %v91_v5 = vld [vmem:[%s3275_s2 + $0x20] sm:$0xff]  ;;  %v94_v51 = vld [vmem:[%s3275_s2 + $0x38] sm:$0xff] }
 0x618   :  { %2440 = vpow2.f32 %v1729_v10  ;;  %v92_v10 = vld [vmem:[%s3275_s2 + $0x28] sm:$0xff]  ;;  %v2339_v12 = vpack.c.bf16 %v94_v51, %v93_v4 }
 0x619   :  { %2442 = vpow2.f32 %v1730_v11  ;;  %v2335_v11 = vpack.c.bf16 %v92_v10, %v91_v5 }
 0x61a   :  { %2444 = vpow2.f32 %v1731_v13  ;;  %v95_v13 = vld [vmem:[%s3275_s2 + $0x40] sm:$0xff] }
 0x61b   :  { %2446 = vtanh.f32 %v1156_v18 }
 0x622   :  { %v2441_v19 = vpop.eup %2440 }
 0x623   :  { %v2443_v22 = vpop.eup %2442  ;;  %v1161_v23 = vadd.f32 1.0, %v2441_v19  ;;  %v97_v19 = vld [vmem:[%s3275_s2 + $0x50] sm:$0xff] }
 0x624   :  { %v1167_v28 = vadd.f32 1.0, %v2443_v22  ;;  %v2445_v29 = vpop.eup %2444  ;;  %v98_v22 = vld [vmem:[%s3275_s2 + $0x58] sm:$0xff] }
 0x625   :  { %2448 = vrcp.f32 %v1161_v23  ;;  %v2447_v30 = vpop.eup %2446  ;;  %v1174_v52 = vadd.f32 1.0, %v2445_v29  ;;  %v2347_v23 = vpack.c.bf16 %v98_v22, %v97_v19  ;;  %v100_v29 = vld [vmem:[%s3275_s2 + $0x68] sm:$0xff] }
 0x626   :  { %2450 = vrcp.f32 %v1167_v28  ;;  %v99_v28 = vld [vmem:[%s3275_s2 + $0x60] sm:$0xff] }
 0x627   :  { %2452 = vrcp.f32 %v1174_v52  ;;  %v1739_v52 = vld [vmem:[%s3274_s0 + $0xe0] sm:$0xff] }
 0x62f   :  { %v2449_v31 = vpop.eup %2448 }
 0x630   :  { %v2451_v41 = vpop.eup %2450  ;;  %v1178_v37 = vmul.f32 %v2449_v31, %v2447_v30  ;;  %v2351_v30 = vpack.c.bf16 %v100_v29, %v99_v28  ;;  %v101_v31 = vld [vmem:[%s3275_s2 + $0x70] sm:$0xff] }
 0x631   :  { %v1177_v54 = vmul.f32 %v2451_v41, %v3070_v40  ;;  %v2453_v36 = vpop.eup %2452  ;;  %v90_v40 = vld [vmem:[%s3275_s2 + $0x18] sm:$0xff] }
 0x632   :  { %v102_v41 = vld [vmem:[%s3275_s2 + $0x78] sm:$0xff] }
 0x633   :  { %v3124_v55 = vadd.f32 %v1178_v37, %v1177_v54  ;;  %v2355_v37 = vpack.c.bf16 %v102_v41, %v101_v31  ;;  %v1740_v54 = vld [vmem:[%s3274_s0 + $0xe8] sm:$0xff] }
 0x635   :  { %2454 = vtanh.f32 %v3124_v55 }
 0x63f   :  { %v2455_v59 = vpop.eup %2454 }
 0x640   :  { %v3127_v60 = vmul.f32 %v2455_v59, %v2453_v36 }
 0x642   :  { %1257 = vmatmul.mubr.f32.vlgmr.msra.gmra.mrb[10].mxu0 %v3127_v60  ;;  %1328 = vmatmul.mubr.f32.vlgmr.msra.gmra.mrb[14].mxu1 %v3127_v60 }
 0x643   :  { %2266 = vmatpush1.bf16.msra.mxu0 %v2536_v8  ;;  %2298 = vmatpush1.bf16.msra.mxu1 %v2695_v56  ;;  %v88_v8 = vld [vmem:[%s3275_s2 + $0x8] sm:$0xff] }
 0x644   :  { %2268 = vmatprep.subr.bf16.mxu0 %v2538_v9  ;;  %2300 = vmatprep.subr.bf16.mxu1 %v2699_v57 }
 0x645   :  { %1436 = vmatprep.mubr.f32.mxu0 %v2488_v3  ;;  %1507 = vmatprep.mubr.f32.mxu1 %v2488_v3  ;;  %v87_v3 = vld [vmem:[%s3275_s2] sm:$0xff] }
 0x646   :  { %v2327_v9 = vpack.c.bf16 %v88_v8, %v87_v3 }
 0x647   :  { %2270 = vmatpush1.bf16.msra.mxu0 %v2555_v14  ;;  %2302 = vmatpush1.bf16.msra.mxu1 %v2716_v62  ;;  %v1732_v14 = vld [vmem:[%s3274_s0 + $0xc0] sm:$0xff] }
 0x648   :  { %2272 = vmatprep.subr.bf16.mxu0 %v2559_v15  ;;  %2304 = vmatprep.subr.bf16.mxu1 %v2720_v63  ;;  %v1733_v15 = vld [vmem:[%s3274_s0 + $0xc8] sm:$0xff] }
 0x64b   :  { %2274 = vmatpush1.bf16.msra.mxu0 %v2575_v20  ;;  %2306 = vmatpush1.bf16.msra.mxu1 %v2735_v6 }
 0x64c   :  { %2276 = vmatprep.subr.bf16.mxu0 %v2579_v21  ;;  %2308 = vmatprep.subr.bf16.mxu1 %v2738_v7 }
 0x64f   :  { %2278 = vmatpush1.bf16.msra.mxu0 %v2595_v26  ;;  %2310 = vmatpush1.bf16.msra.mxu1 %v2753_v16 }
 0x650   :  { %2280 = vmatprep.subr.bf16.mxu0 %v2599_v27  ;;  %2312 = vmatprep.subr.bf16.mxu1 %v2756_v17 }
 0x653   :  { %2282 = vmatpush1.bf16.msra.mxu0 %v2615_v32  ;;  %2314 = vmatpush1.bf16.msra.mxu1 %v2771_v24 }
 0x654   :  { %2284 = vmatprep.subr.bf16.mxu0 %v2619_v33  ;;  %2316 = vmatprep.subr.bf16.mxu1 %v2774_v25 }
 0x657   :  { %2286 = vmatpush1.bf16.msra.mxu0 %v2635_v38  ;;  %2318 = vmatpush1.bf16.msra.mxu1 %v2789_v34 }
 0x658   :  { %2288 = vmatprep.subr.bf16.mxu0 %v2639_v39  ;;  %2320 = vmatprep.subr.bf16.mxu1 %v2792_v35 }
 0x65b   :  { %2290 = vmatpush1.bf16.msra.mxu0 %v2655_v44  ;;  %2322 = vmatpush1.bf16.msra.mxu1 %v2807_v42  ;;  %v1735_v44 = vld [vmem:[%s3274_s0 + $0xd8] sm:$0xff] }
 0x65c   :  { %2292 = vmatprep.subr.bf16.mxu0 %v2659_v45  ;;  %2324 = vmatprep.subr.bf16.mxu1 %v2810_v43 }
 0x65f   :  { %2294 = vmatpush1.bf16.msra.mxu0 %v2675_v50  ;;  %2326 = vmatpush1.bf16.msra.mxu1 %v2819_v48  ;;  %v1734_v50 = vld [vmem:[%s3274_s0 + $0xd0] sm:$0xff] }
 0x660   :  { %2328 = vmatprep.subr.bf16.mxu0 %v2327_v9  ;;  %v89_v48 = vld [vmem:[%s3275_s2 + $0x10] sm:$0xff] }
 0x661   :  { %v2331_v2 = vpack.c.bf16 %v90_v40, %v89_v48 }
 0x715   :  { %v1258_v20 = vpop.f32.mrb[10].mxu0  ;;  %v1329_v21 = vpop.f32.mrb[14].mxu1 }
 0x716   :  { %v1334_v26 = vadd.f32 %v1732_v14, %v1258_v20  ;;  %v1260_v27 = vpop.f32.mrb[11].mxu0  ;;  %v1331_v32 = vpop.f32.mrb[15].mxu1  ;;  %v1336_v57 = vadd.f32 %v1734_v50, %v1329_v21 }
 0x717   :  { %v1335_v33 = vadd.f32 %v1733_v15, %v1260_v27  ;;  %v1337_v45 = vadd.f32 %v1735_v44, %v1331_v32 }
 0x718   :  { %v1736_v38 = vmul.f32 -1.442695, %v1334_v26 }
 0x719   :  { %v1737_v39 = vmul.f32 -1.442695, %v1335_v33  ;;  %v1738_v56 = vmul.f32 -1.442695, %v1337_v45 }
 0x71a   :  { %2456 = vpow2.f32 %v1736_v38 }
 0x71b   :  { %2458 = vpow2.f32 %v1737_v39 }
 0x71c   :  { %2460 = vpow2.f32 %v1738_v56  ;;  %v1746_v56 = vld [vmem:[%s3276_s3] ss:$0 sm:$0xff] }
 0x71d   :  { %2462 = vtanh.f32 %v1336_v57 }
 0x724   :  { %v2457_v62 = vpop.eup %2456 }
 0x725   :  { %v2459_v63 = vpop.eup %2458  ;;  %v1341_v6 = vadd.f32 1.0, %v2457_v62 }
 0x726   :  { %v1347_v7 = vadd.f32 1.0, %v2459_v63  ;;  %v2461_v16 = vpop.eup %2460 }
 0x727   :  { %2464 = vrcp.f32 %v1341_v6  ;;  %v2463_v17 = vpop.eup %2462  ;;  %v1354_v35 = vadd.f32 1.0, %v2461_v16 }
 0x728   :  { %2466 = vrcp.f32 %v1347_v7 }
 0x729   :  { %2468 = vrcp.f32 %v1354_v35 }
 0x731   :  { %v2465_v24 = vpop.eup %2464 }
 0x732   :  { %v2467_v25 = vpop.eup %2466  ;;  %v1358_v34 = vmul.f32 %v2465_v24, %v2463_v17 }
 0x733   :  { %v1357_v42 = vmul.f32 %v2467_v25, %v3124_v55  ;;  %v2469_v61 = vpop.eup %2468 }
 0x735   :  { %v3182_v43 = vadd.f32 %v1358_v34, %v1357_v42 }
 0x737   :  { %2470 = vtanh.f32 %v3182_v43 }
 0x741   :  { %v2471_v0 = vpop.eup %2470 }
 0x742   :  { %v1361_v1 = vmul.f32 %v2471_v0, %v2469_v61 }
 0x744   :  { %1437 = vmatmul.mubr.f32.vlgmr.msra.gmra.mrb[12].mxu0 %v1361_v1  ;;  %1508 = vmatmul.mubr.f32.vlgmr.msra.gmra.mrb[16].mxu1 %v1361_v1 }
 0x745   :  { %2330 = vmatpush3.bf16.msra.mxu0 %v2327_v9  ;;  %1803 = vmatprep.mubr.f32.mxu0 %v2857_v46  ;;  %v96_v46 = vld [vmem:[%s3275_s2 + $0x48] sm:$0xff]  ;;  %v1741_v9 = vld [vmem:[%s3274_s0 + $0xf0] sm:$0xff] }
 0x746   :  { %2332 = vmatprep.subr.bf16.mxu0 %v2331_v2  ;;  %v2343_v18 = vpack.c.bf16 %v96_v46, %v95_v13 }
 0x749   :  { %2334 = vmatpush3.bf16.msra.mxu0 %v2331_v2 }
 0x74a   :  { %2336 = vmatprep.subr.bf16.mxu0 %v2335_v11 }
 0x74d   :  { %2338 = vmatpush3.bf16.msra.mxu0 %v2335_v11 }
 0x74e   :  { %2340 = vmatprep.subr.bf16.mxu0 %v2339_v12 }
 0x751   :  { %2342 = vmatpush3.bf16.msra.mxu0 %v2339_v12 }
 0x752   :  { %2344 = vmatprep.subr.bf16.mxu0 %v2343_v18 }
 0x755   :  { %2346 = vmatpush3.bf16.msra.mxu0 %v2343_v18 }
 0x756   :  { %2348 = vmatprep.subr.bf16.mxu0 %v2347_v23 }
 0x759   :  { %2350 = vmatpush3.bf16.msra.mxu0 %v2347_v23 }
 0x75a   :  { %2352 = vmatprep.subr.bf16.mxu0 %v2351_v30 }
 0x75d   :  { %2354 = vmatpush3.bf16.msra.mxu0 %v2351_v30 }
 0x75e   :  { %2356 = vmatprep.subr.bf16.mxu0 %v2355_v37 }
 0x761   :  { %2358 = vmatpush3.bf16.msra.mxu0 %v2355_v37 }
 0x764   :  { %1804 = vmatmul.mubr.f32.vlgmr.msra.gmra.mrb[14].mxu0 %v2911_v47 }
 0x765   :  { %1806 = vmatprep.mubr.f32.mxu0 %v2965_v49 }
 0x768   :  { %1807 = vmatmul.mubr.f32.gmra.mrb[16].mxu0 %v3019_v53 }
 0x769   :  { %1809 = vmatprep.mubr.f32.mxu0 %v3073_v58  ;;  %v1742_v58 = vld [vmem:[%s3274_s0 + $0xf8] sm:$0xff] }
 0x76c   :  { %1810 = vmatmul.mubr.f32.gmra.mrb[18].mxu0 %v3127_v60 }
 0x76d   :  { %1812 = vmatprep.mubr.f32.mxu0 %v1361_v1 }
 0x817   :  { %v1438_v55 = vpop.f32.mrb[12].mxu0  ;;  %v1509_v36 = vpop.f32.mrb[16].mxu1 }
 0x818   :  { %v1514_v47 = vadd.f32 %v1739_v52, %v1438_v55  ;;  %v1440_v59 = vpop.f32.mrb[13].mxu0  ;;  %v1511_v49 = vpop.f32.mrb[17].mxu1  ;;  %v1516_v15 = vadd.f32 %v1741_v9, %v1509_v36 }
 0x819   :  { %v1515_v3 = vadd.f32 %v1740_v54, %v1440_v59  ;;  %v1517_v60 = vadd.f32 %v1742_v58, %v1511_v49 }
 0x81a   :  { %v1743_v53 = vmul.f32 -1.442695, %v1514_v47 }
 0x81b   :  { %v1744_v8 = vmul.f32 -1.442695, %v1515_v3  ;;  %v1745_v14 = vmul.f32 -1.442695, %v1517_v60 }
 0x81c   :  { %2472 = vpow2.f32 %v1743_v53 }
 0x81d   :  { %2474 = vpow2.f32 %v1744_v8 }
 0x81e   :  { %2476 = vpow2.f32 %v1745_v14 }
 0x81f   :  { %2478 = vtanh.f32 %v1516_v15 }
 0x826   :  { %v2473_v20 = vpop.eup %2472 }
 0x827   :  { %v2475_v21 = vpop.eup %2474  ;;  %v1521_v26 = vadd.f32 1.0, %v2473_v20 }
 0x828   :  { %v1527_v27 = vadd.f32 1.0, %v2475_v21  ;;  %v2477_v32 = vpop.eup %2476 }
 0x829   :  { %2480 = vrcp.f32 %v1521_v26  ;;  %v2479_v33 = vpop.eup %2478  ;;  %v1534_v45 = vadd.f32 1.0, %v2477_v32 }
 0x82a   :  { %2482 = vrcp.f32 %v1527_v27 }
 0x82b   :  { %2484 = vrcp.f32 %v1534_v45 }
 0x833   :  { %v2481_v38 = vpop.eup %2480 }
 0x834   :  { %v2483_v39 = vpop.eup %2482  ;;  %v1538_v44 = vmul.f32 %v2481_v38, %v2479_v33 }
 0x835   :  { %v1537_v50 = vmul.f32 %v2483_v39, %v3182_v43  ;;  %v2485_v1 = vpop.eup %2484 }
 0x837   :  { %v1805_v57 = vpop.f32.mrb[14].mxu0  ;;  %v1539_v62 = vadd.f32 %v1538_v44, %v1537_v50 }
 0x838   :  { %v1630_v63 = vadd.f32 %v1805_v57, %v1746_v56  ;;  %v1624_v6 = vpop.f32.mrb[15].mxu0 }
 0x839   :  { %v1625_v7 = vadd.f32 %v1746_v56, %v1624_v6  ;;  %2486 = vtanh.f32 %v1539_v62 }
 0x83a   :  { %v1664_v16 = vmax.f32 %v1630_v63, 0.0 }
 0x83b   :  { %v1663_v17 = vmax.f32 %v1625_v7, 0.0  ;;  %v1808_v24 = vpop.f32.mrb[16].mxu0 }
 0x83c   :  { %1674 = vst [vmem:[%s3277_s4 + $0x8] sm:$0xff] %v1664_v16  ;;  %v1640_v25 = vadd.f32 %v1808_v24, %v1746_v56  ;;  %v1634_v34 = vpop.f32.mrb[17].mxu0 }
 0x83d   :  { %1673 = vst [vmem:[%s3277_s4] sm:$0xff] %v1663_v17  ;;  %v1635_v35 = vadd.f32 %v1746_v56, %v1634_v34 }
 0x83e   :  { %v1666_v42 = vmax.f32 %v1640_v25, 0.0 }
 0x83f   :  { %v1665_v43 = vmax.f32 %v1635_v35, 0.0  ;;  %v1811_v48 = vpop.f32.mrb[18].mxu0 }
 0x840   :  { %1676 = vst [vmem:[%s3277_s4 + $0x18] sm:$0xff] %v1666_v42  ;;  %v1650_v40 = vadd.f32 %v1811_v48, %v1746_v56  ;;  %v1644_v61 = vpop.f32.mrb[19].mxu0 }
 0x841   :  { %1675 = vst [vmem:[%s3277_s4 + $0x10] sm:$0xff] %v1665_v43  ;;  %v1645_v0 = vadd.f32 %v1746_v56, %v1644_v61 }
 0x842   :  { %v1668_v2 = vmax.f32 %v1650_v40, 0.0 }
 0x843   :  { %v2487_v5 = vpop.eup %2486  ;;  %v1667_v10 = vmax.f32 %v1645_v0, 0.0 }
 0x844   :  { %1678 = vst [vmem:[%s3277_s4 + $0x28] sm:$0xff] %v1668_v2  ;;  %v1541_v11 = vmul.f32 %v2487_v5, %v2485_v1 }
 0x845   :  { %1677 = vst [vmem:[%s3277_s4 + $0x20] sm:$0xff] %v1667_v10 }
 0x846   :  { %1813 = vmatmul.mubr.f32.gmra.mrb[20].mxu0 %v1541_v11 }
 0x919   :  { %v1814_v4 = vpop.f32.mrb[20].mxu0 }
 0x91a   :  { %v1660_v51 = vadd.f32 %v1814_v4, %v1746_v56  ;;  %v1654_v12 = vpop.f32.mrb[21].mxu0 }
 0x91b   :  { %v1655_v13 = vadd.f32 %v1746_v56, %v1654_v12 }
 0x91c   :  { %v1670_v46 = vmax.f32 %v1660_v51, 0.0 }
 0x91d   :  { %v1669_v18 = vmax.f32 %v1655_v13, 0.0 }
 0x91e   :  { %1680 = vst [vmem:[%s3277_s4 + $0x38] sm:$0xff] %v1670_v46 }
 0x91f   :  { %1679 = vst [vmem:[%s3277_s4 + $0x30] sm:$0xff] %v1669_v18 }

</bundles_post_ra>
